<compile_context>
chip_gen: v7x
topology: tpu7x:2x2x1
jax: 0.10.0
libtpu: 0.0.40
codegen_flags: <defaults>
</compile_context>

<pallas_src>
import functools

import jax
import jax.numpy as jnp
from jax.experimental import pallas as pl
from jax.experimental.pallas import tpu as pltpu


def lstm_head_kernel(x_ref, wih_ref, whh_ref, b_ref, wlin_ref, blin_ref,
                     out_ref, xg_ref):
    # x_ref:    (T*Bp, I)   time-major, batch-padded input rows (row t*Bp+b = x[b, t])
    # wih_ref:  (I, 4*Hp)   W_ih^T, per-gate columns at 128-lane-aligned offsets
    # whh_ref:  (Hp, 4*Hp)  W_hh^T, same column layout, rows >= H are zero
    # b_ref:    (1, 4*Hp)   b_ih + b_hh in the same padded layout
    # wlin_ref: (Hp, 1)     linear.weight^T (rows >= H zero)
    # blin_ref: (1, 1)      linear.bias
    # out_ref:  (Bp, 1)     sigmoid(linear(h_T)); rows >= B are ignored
    # xg_ref:   (T*Bp, 4*Hp) scratch holding the hoisted input projection
    TB, _ = x_ref.shape
    Hp = whh_ref.shape[0]
    Bp = out_ref.shape[0]
    T = TB // Bp

    # ---- hoisted: one matmul for all timesteps, bias folded in --------------
    xg_ref[...] = (
        jnp.dot(x_ref[...], wih_ref[...], preferred_element_type=jnp.float32)
        + b_ref[...])

    # ---- recurrence: state lives in vregs, loop fully unrolled (T static) ---
    h = jnp.zeros((Bp, Hp), jnp.float32)
    c = jnp.zeros((Bp, Hp), jnp.float32)

    for t in range(T):
        gates = (xg_ref[t * Bp:(t + 1) * Bp, :]
                 + jnp.dot(h, whh_ref[...],
                           preferred_element_type=jnp.float32))    # (Bp, 4Hp)
        # each gate block is one aligned 128-lane slab -> whole-vreg slices
        i_g = jax.nn.sigmoid(gates[:, 0 * Hp:1 * Hp])
        f_g = jax.nn.sigmoid(gates[:, 1 * Hp:2 * Hp])
        g_g = jnp.tanh(gates[:, 2 * Hp:3 * Hp])
        o_g = jax.nn.sigmoid(gates[:, 3 * Hp:4 * Hp])
        c = f_g * c + i_g * g_g
        h = o_g * jnp.tanh(c)

    # ---- head: linear(H,1) + sigmoid ----------------------------------------
    logits = (jnp.dot(h, wlin_ref[...], preferred_element_type=jnp.float32)
              + blin_ref[...])
    out_ref[...] = jax.nn.sigmoid(logits)


@functools.partial(jax.jit, static_argnames=())
def lstm_forward(x, w_ih, w_hh, b_ih, b_hh, w_lin, b_lin):
    """x: (B, T, I) float32.  Returns (B,) float32 — same as Model.forward."""
    B, T, I = x.shape
    H = w_hh.shape[1]
    f32 = jnp.float32

    Hp = ((H + 127) // 128) * 128     # pad hidden to a full lane tile (128)
    Bp = ((B + 7) // 8) * 8           # pad batch to a full sublane tile (8)

    # ---- time-major, batch-padded, flattened input: row t*Bp+b = x[b, t] ----
    x_tm = jnp.transpose(x, (1, 0, 2)).astype(f32)            # (T, B, I)
    x_tm = jnp.pad(x_tm, ((0, 0), (0, Bp - B), (0, 0)))       # (T, Bp, I)
    x2d = x_tm.reshape(T * Bp, I)                             # (T*Bp, I)

    # ---- weights re-laid out so each gate occupies an aligned 128-lane slab --
    wih_p = jnp.zeros((I, 4 * Hp), f32)
    whh_p = jnp.zeros((Hp, 4 * Hp), f32)
    b_p = jnp.zeros((1, 4 * Hp), f32)
    b_sum = (b_ih + b_hh).astype(f32)
    for g in range(4):
        wih_p = wih_p.at[:, g * Hp:g * Hp + H].set(
            w_ih[g * H:(g + 1) * H, :].T.astype(f32))
        whh_p = whh_p.at[:H, g * Hp:g * Hp + H].set(
            w_hh[g * H:(g + 1) * H, :].T.astype(f32))
        b_p = b_p.at[0, g * Hp:g * Hp + H].set(b_sum[g * H:(g + 1) * H])

    wlin_p = jnp.zeros((Hp, 1), f32).at[:H, :].set(w_lin.T.astype(f32))
    blin = b_lin.reshape(1, 1).astype(f32)

    out = pl.pallas_call(
        lstm_head_kernel,
        out_shape=jax.ShapeDtypeStruct((Bp, 1), f32),
        grid_spec=pltpu.PrefetchScalarGridSpec(
            num_scalar_prefetch=0,
            grid=(1,),
            in_specs=[
                pl.BlockSpec((T * Bp, I), lambda i: (0, 0)),
                pl.BlockSpec((I, 4 * Hp), lambda i: (0, 0)),
                pl.BlockSpec((Hp, 4 * Hp), lambda i: (0, 0)),
                pl.BlockSpec((1, 4 * Hp), lambda i: (0, 0)),
                pl.BlockSpec((Hp, 1), lambda i: (0, 0)),
                pl.BlockSpec((1, 1), lambda i: (0, 0)),
            ],
            out_specs=pl.BlockSpec((Bp, 1), lambda i: (0, 0)),
            scratch_shapes=[
                pltpu.VMEM((T * Bp, 4 * Hp), f32),   # hoisted input projection
            ],
        ),
        compiler_params=pltpu.CompilerParams(
            dimension_semantics=("arbitrary",)),
    )(x2d, wih_p, whh_p, b_p, wlin_p, blin)

    return out[:B, 0]                                          # (B,)


if __name__ == "__main__":
    # Small shapes consistent with the module's forward:
    # batchSize=2, sequenceLength=8, inputSize=16, hiddenSize=32.
    B, T, I, H = 2, 8, 16, 32

    key = jax.random.PRNGKey(0)
    ks = jax.random.split(key, 7)
    scale = 1.0 / jnp.sqrt(jnp.float32(H))   # torch LSTM/Linear init range

    x     = jax.random.normal(ks[0], (B, T, I), dtype=jnp.float32)
    w_ih  = jax.random.uniform(ks[1], (4 * H, I), minval=-scale, maxval=scale)
    w_hh  = jax.random.uniform(ks[2], (4 * H, H), minval=-scale, maxval=scale)
    b_ih  = jax.random.uniform(ks[3], (4 * H,),   minval=-scale, maxval=scale)
    b_hh  = jax.random.uniform(ks[4], (4 * H,),   minval=-scale, maxval=scale)
    w_lin = jax.random.uniform(ks[5], (1, H),     minval=-scale, maxval=scale)
    b_lin = jax.random.uniform(ks[6], (1,),       minval=-scale, maxval=scale)

    out = lstm_forward(x, w_ih, w_hh, b_ih, b_hh, w_lin, b_lin)
    out = jax.block_until_ready(out)

    # Pure-JAX reference of the same math (LSTM scan + linear + sigmoid).
    def ref():
        h = jnp.zeros((B, H), jnp.float32)
        c = jnp.zeros((B, H), jnp.float32)
        for t in range(T):
            g = x[:, t, :] @ w_ih.T + h @ w_hh.T + b_ih + b_hh
            i_g = jax.nn.sigmoid(g[:, 0*H:1*H])
            f_g = jax.nn.sigmoid(g[:, 1*H:2*H])
            g_g = jnp.tanh(g[:, 2*H:3*H])
            o_g = jax.nn.sigmoid(g[:, 3*H:4*H])
            c = f_g * c + i_g * g_g
            h = o_g * jnp.tanh(c)
        return jax.nn.sigmoid(jnp.squeeze(h @ w_lin.T + b_lin, axis=1))

    assert out.shape == (B,)
    assert jnp.allclose(out, ref(), atol=1e-5, rtol=1e-5)
    print("KERNEL_OK")
</pallas_src>

<mosaic_0001>
module attributes {stable_mosaic.version = 11 : i64} {
  func.func @lstm_head_kernel(%arg0: i32, %arg1: memref<64x16xf32, #tpu.memory_space<vmem>>, %arg2: memref<16x512xf32, #tpu.memory_space<vmem>>, %arg3: memref<128x512xf32, #tpu.memory_space<vmem>>, %arg4: memref<1x512xf32, #tpu.memory_space<vmem>>, %arg5: memref<128x1xf32, #tpu.memory_space<vmem>>, %arg6: memref<1x1xf32, #tpu.memory_space<vmem>>, %arg7: memref<8x1xf32, #tpu.memory_space<vmem>>, %arg8: memref<64x512xf32, #tpu.memory_space<vmem>>) attributes {dimension_semantics = [#tpu.dimension_semantics<arbitrary>], iteration_bounds = array<i64: 1>, scalar_prefetch = 0 : i64, scratch_operands = 1 : i64, tpu.core_type = #tpu.core_type<tc>, window_params = [{pipeline_mode = #tpu.pipeline_mode<synchronous>, transform_indices = @transform_0, window_bounds = array<i64: 64, 16>}, {pipeline_mode = #tpu.pipeline_mode<synchronous>, transform_indices = @transform_1, window_bounds = array<i64: 16, 512>}, {pipeline_mode = #tpu.pipeline_mode<synchronous>, transform_indices = @transform_2, window_bounds = array<i64: 128, 512>}, {pipeline_mode = #tpu.pipeline_mode<synchronous>, transform_indices = @transform_3, window_bounds = array<i64: 1, 512>}, {pipeline_mode = #tpu.pipeline_mode<synchronous>, transform_indices = @transform_4, window_bounds = array<i64: 128, 1>}, {pipeline_mode = #tpu.pipeline_mode<synchronous>, transform_indices = @transform_5, window_bounds = array<i64: 1, 1>}, {pipeline_mode = #tpu.pipeline_mode<synchronous>, transform_indices = @transform_6, window_bounds = array<i64: 8, 1>}]} {
    %c0 = arith.constant 0 : index
    %c0_0 = arith.constant 0 : index
    %0 = vector.load %arg1[%c0, %c0_0] : memref<64x16xf32, #tpu.memory_space<vmem>>, vector<64x16xf32>
    %c0_1 = arith.constant 0 : index
    %c0_2 = arith.constant 0 : index
    %1 = vector.load %arg2[%c0_1, %c0_2] : memref<16x512xf32, #tpu.memory_space<vmem>>, vector<16x512xf32>
    %cst = arith.constant dense<0.000000e+00> : vector<64x512xf32>
    %2 = tpu.matmul %0, %1, %cst {dimension_numbers = #tpu.dot_dimension_numbers<[1], [0], [0], [1], [0, 0, 1, 1], [], []>} : vector<64x16xf32>, vector<16x512xf32>, vector<64x512xf32> -> vector<64x512xf32>
    %c0_3 = arith.constant 0 : index
    %c0_4 = arith.constant 0 : index
    %3 = vector.load %arg4[%c0_3, %c0_4] : memref<1x512xf32, #tpu.memory_space<vmem>>, vector<1x512xf32>
    %4 = vector.broadcast %3 : vector<1x512xf32> to vector<64x512xf32>
    %5 = arith.addf %2, %4 : vector<64x512xf32>
    %c0_5 = arith.constant 0 : index
    %c0_6 = arith.constant 0 : index
    %6 = vector.load %arg8[%c0_5, %c0_6] : memref<64x512xf32, #tpu.memory_space<vmem>>, vector<64x512xf32>
    tpu.vector_store %arg8[%c0_5, %c0_6], %5 {strides = array<i32>} : memref<64x512xf32, #tpu.memory_space<vmem>>, vector<64x512xf32>,
    %cst_7 = arith.constant 0.000000e+00 : f32
    %7 = vector.broadcast %cst_7 : f32 to vector<8x128xf32>
    %cst_8 = arith.constant 0.000000e+00 : f32
    %8 = vector.broadcast %cst_8 : f32 to vector<8x128xf32>
    %c0_9 = arith.constant 0 : index
    %c0_10 = arith.constant 0 : index
    %9 = vector.load %arg8[%c0_9, %c0_10] : memref<64x512xf32, #tpu.memory_space<vmem>>, vector<8x512xf32>
    %c0_11 = arith.constant 0 : index
    %c0_12 = arith.constant 0 : index
    %10 = vector.load %arg3[%c0_11, %c0_12] : memref<128x512xf32, #tpu.memory_space<vmem>>, vector<128x512xf32>
    %cst_13 = arith.constant dense<0.000000e+00> : vector<8x512xf32>
    %11 = tpu.matmul %7, %10, %cst_13 {dimension_numbers = #tpu.dot_dimension_numbers<[1], [0], [0], [1], [0, 0, 1, 1], [], []>} : vector<8x128xf32>, vector<128x512xf32>, vector<8x512xf32> -> vector<8x512xf32>
    %12 = arith.addf %9, %11 : vector<8x512xf32>
    %13 = vector.extract_strided_slice %12 {offsets = [0, 0], sizes = [8, 128], strides = [1, 1]} : vector<8x512xf32> to vector<8x128xf32>
    %14 = arith.negf %13 : vector<8x128xf32>
    %15 = math.exp %14 : vector<8x128xf32>
    %cst_14 = arith.constant 1.000000e+00 : f32
    %16 = vector.broadcast %cst_14 : f32 to vector<8x128xf32>
    %17 = arith.addf %16, %15 : vector<8x128xf32>
    %18 = arith.divf %16, %17 : vector<8x128xf32>
    %19 = vector.extract_strided_slice %12 {offsets = [0, 128], sizes = [8, 128], strides = [1, 1]} : vector<8x512xf32> to vector<8x128xf32>
    %20 = arith.negf %19 : vector<8x128xf32>
    %21 = math.exp %20 : vector<8x128xf32>
    %cst_15 = arith.constant 1.000000e+00 : f32
    %22 = vector.broadcast %cst_15 : f32 to vector<8x128xf32>
    %23 = arith.addf %22, %21 : vector<8x128xf32>
    %24 = arith.divf %22, %23 : vector<8x128xf32>
    %25 = vector.extract_strided_slice %12 {offsets = [0, 256], sizes = [8, 128], strides = [1, 1]} : vector<8x512xf32> to vector<8x128xf32>
    %26 = math.tanh %25 : vector<8x128xf32>
    %27 = vector.extract_strided_slice %12 {offsets = [0, 384], sizes = [8, 128], strides = [1, 1]} : vector<8x512xf32> to vector<8x128xf32>
    %28 = arith.negf %27 : vector<8x128xf32>
    %29 = math.exp %28 : vector<8x128xf32>
    %cst_16 = arith.constant 1.000000e+00 : f32
    %30 = vector.broadcast %cst_16 : f32 to vector<8x128xf32>
    %31 = arith.addf %30, %29 : vector<8x128xf32>
    %32 = arith.divf %30, %31 : vector<8x128xf32>
    %33 = arith.mulf %24, %8 : vector<8x128xf32>
    %34 = arith.mulf %18, %26 : vector<8x128xf32>
    %35 = arith.addf %33, %34 : vector<8x128xf32>
    %36 = math.tanh %35 : vector<8x128xf32>
    %37 = arith.mulf %32, %36 : vector<8x128xf32>
    %c8 = arith.constant 8 : index
    %c0_17 = arith.constant 0 : index
    %38 = vector.load %arg8[%c8, %c0_17] : memref<64x512xf32, #tpu.memory_space<vmem>>, vector<8x512xf32>
    %c0_18 = arith.constant 0 : index
    %c0_19 = arith.constant 0 : index
    %39 = vector.load %arg3[%c0_18, %c0_19] : memref<128x512xf32, #tpu.memory_space<vmem>>, vector<128x512xf32>
    %cst_20 = arith.constant dense<0.000000e+00> : vector<8x512xf32>
    %40 = tpu.matmul %37, %39, %cst_20 {dimension_numbers = #tpu.dot_dimension_numbers<[1], [0], [0], [1], [0, 0, 1, 1], [], []>} : vector<8x128xf32>, vector<128x512xf32>, vector<8x512xf32> -> vector<8x512xf32>
    %41 = arith.addf %38, %40 : vector<8x512xf32>
    %42 = vector.extract_strided_slice %41 {offsets = [0, 0], sizes = [8, 128], strides = [1, 1]} : vector<8x512xf32> to vector<8x128xf32>
    %43 = arith.negf %42 : vector<8x128xf32>
    %44 = math.exp %43 : vector<8x128xf32>
    %cst_21 = arith.constant 1.000000e+00 : f32
    %45 = vector.broadcast %cst_21 : f32 to vector<8x128xf32>
    %46 = arith.addf %45, %44 : vector<8x128xf32>
    %47 = arith.divf %45, %46 : vector<8x128xf32>
    %48 = vector.extract_strided_slice %41 {offsets = [0, 128], sizes = [8, 128], strides = [1, 1]} : vector<8x512xf32> to vector<8x128xf32>
    %49 = arith.negf %48 : vector<8x128xf32>
    %50 = math.exp %49 : vector<8x128xf32>
    %cst_22 = arith.constant 1.000000e+00 : f32
    %51 = vector.broadcast %cst_22 : f32 to vector<8x128xf32>
    %52 = arith.addf %51, %50 : vector<8x128xf32>
    %53 = arith.divf %51, %52 : vector<8x128xf32>
    %54 = vector.extract_strided_slice %41 {offsets = [0, 256], sizes = [8, 128], strides = [1, 1]} : vector<8x512xf32> to vector<8x128xf32>
    %55 = math.tanh %54 : vector<8x128xf32>
    %56 = vector.extract_strided_slice %41 {offsets = [0, 384], sizes = [8, 128], strides = [1, 1]} : vector<8x512xf32> to vector<8x128xf32>
    %57 = arith.negf %56 : vector<8x128xf32>
    %58 = math.exp %57 : vector<8x128xf32>
    %cst_23 = arith.constant 1.000000e+00 : f32
    %59 = vector.broadcast %cst_23 : f32 to vector<8x128xf32>
    %60 = arith.addf %59, %58 : vector<8x128xf32>
    %61 = arith.divf %59, %60 : vector<8x128xf32>
    %62 = arith.mulf %53, %35 : vector<8x128xf32>
    %63 = arith.mulf %47, %55 : vector<8x128xf32>
    %64 = arith.addf %62, %63 : vector<8x128xf32>
    %65 = math.tanh %64 : vector<8x128xf32>
    %66 = arith.mulf %61, %65 : vector<8x128xf32>
    %c16 = arith.constant 16 : index
    %c0_24 = arith.constant 0 : index
    %67 = vector.load %arg8[%c16, %c0_24] : memref<64x512xf32, #tpu.memory_space<vmem>>, vector<8x512xf32>
    %c0_25 = arith.constant 0 : index
    %c0_26 = arith.constant 0 : index
    %68 = vector.load %arg3[%c0_25, %c0_26] : memref<128x512xf32, #tpu.memory_space<vmem>>, vector<128x512xf32>
    %cst_27 = arith.constant dense<0.000000e+00> : vector<8x512xf32>
    %69 = tpu.matmul %66, %68, %cst_27 {dimension_numbers = #tpu.dot_dimension_numbers<[1], [0], [0], [1], [0, 0, 1, 1], [], []>} : vector<8x128xf32>, vector<128x512xf32>, vector<8x512xf32> -> vector<8x512xf32>
    %70 = arith.addf %67, %69 : vector<8x512xf32>
    %71 = vector.extract_strided_slice %70 {offsets = [0, 0], sizes = [8, 128], strides = [1, 1]} : vector<8x512xf32> to vector<8x128xf32>
    %72 = arith.negf %71 : vector<8x128xf32>
    %73 = math.exp %72 : vector<8x128xf32>
    %cst_28 = arith.constant 1.000000e+00 : f32
    %74 = vector.broadcast %cst_28 : f32 to vector<8x128xf32>
    %75 = arith.addf %74, %73 : vector<8x128xf32>
    %76 = arith.divf %74, %75 : vector<8x128xf32>
    %77 = vector.extract_strided_slice %70 {offsets = [0, 128], sizes = [8, 128], strides = [1, 1]} : vector<8x512xf32> to vector<8x128xf32>
    %78 = arith.negf %77 : vector<8x128xf32>
    %79 = math.exp %78 : vector<8x128xf32>
    %cst_29 = arith.constant 1.000000e+00 : f32
    %80 = vector.broadcast %cst_29 : f32 to vector<8x128xf32>
    %81 = arith.addf %80, %79 : vector<8x128xf32>
    %82 = arith.divf %80, %81 : vector<8x128xf32>
    %83 = vector.extract_strided_slice %70 {offsets = [0, 256], sizes = [8, 128], strides = [1, 1]} : vector<8x512xf32> to vector<8x128xf32>
    %84 = math.tanh %83 : vector<8x128xf32>
    %85 = vector.extract_strided_slice %70 {offsets = [0, 384], sizes = [8, 128], strides = [1, 1]} : vector<8x512xf32> to vector<8x128xf32>
    %86 = arith.negf %85 : vector<8x128xf32>
    %87 = math.exp %86 : vector<8x128xf32>
    %cst_30 = arith.constant 1.000000e+00 : f32
    %88 = vector.broadcast %cst_30 : f32 to vector<8x128xf32>
    %89 = arith.addf %88, %87 : vector<8x128xf32>
    %90 = arith.divf %88, %89 : vector<8x128xf32>
    %91 = arith.mulf %82, %64 : vector<8x128xf32>
    %92 = arith.mulf %76, %84 : vector<8x128xf32>
    %93 = arith.addf %91, %92 : vector<8x128xf32>
    %94 = math.tanh %93 : vector<8x128xf32>
    %95 = arith.mulf %90, %94 : vector<8x128xf32>
    %c24 = arith.constant 24 : index
    %c0_31 = arith.constant 0 : index
    %96 = vector.load %arg8[%c24, %c0_31] : memref<64x512xf32, #tpu.memory_space<vmem>>, vector<8x512xf32>
    %c0_32 = arith.constant 0 : index
    %c0_33 = arith.constant 0 : index
    %97 = vector.load %arg3[%c0_32, %c0_33] : memref<128x512xf32, #tpu.memory_space<vmem>>, vector<128x512xf32>
    %cst_34 = arith.constant dense<0.000000e+00> : vector<8x512xf32>
    %98 = tpu.matmul %95, %97, %cst_34 {dimension_numbers = #tpu.dot_dimension_numbers<[1], [0], [0], [1], [0, 0, 1, 1], [], []>} : vector<8x128xf32>, vector<128x512xf32>, vector<8x512xf32> -> vector<8x512xf32>
    %99 = arith.addf %96, %98 : vector<8x512xf32>
    %100 = vector.extract_strided_slice %99 {offsets = [0, 0], sizes = [8, 128], strides = [1, 1]} : vector<8x512xf32> to vector<8x128xf32>
    %101 = arith.negf %100 : vector<8x128xf32>
    %102 = math.exp %101 : vector<8x128xf32>
    %cst_35 = arith.constant 1.000000e+00 : f32
    %103 = vector.broadcast %cst_35 : f32 to vector<8x128xf32>
    %104 = arith.addf %103, %102 : vector<8x128xf32>
    %105 = arith.divf %103, %104 : vector<8x128xf32>
    %106 = vector.extract_strided_slice %99 {offsets = [0, 128], sizes = [8, 128], strides = [1, 1]} : vector<8x512xf32> to vector<8x128xf32>
    %107 = arith.negf %106 : vector<8x128xf32>
    %108 = math.exp %107 : vector<8x128xf32>
    %cst_36 = arith.constant 1.000000e+00 : f32
    %109 = vector.broadcast %cst_36 : f32 to vector<8x128xf32>
    %110 = arith.addf %109, %108 : vector<8x128xf32>
    %111 = arith.divf %109, %110 : vector<8x128xf32>
    %112 = vector.extract_strided_slice %99 {offsets = [0, 256], sizes = [8, 128], strides = [1, 1]} : vector<8x512xf32> to vector<8x128xf32>
    %113 = math.tanh %112 : vector<8x128xf32>
    %114 = vector.extract_strided_slice %99 {offsets = [0, 384], sizes = [8, 128], strides = [1, 1]} : vector<8x512xf32> to vector<8x128xf32>
    %115 = arith.negf %114 : vector<8x128xf32>
    %116 = math.exp %115 : vector<8x128xf32>
    %cst_37 = arith.constant 1.000000e+00 : f32
    %117 = vector.broadcast %cst_37 : f32 to vector<8x128xf32>
    %118 = arith.addf %117, %116 : vector<8x128xf32>
    %119 = arith.divf %117, %118 : vector<8x128xf32>
    %120 = arith.mulf %111, %93 : vector<8x128xf32>
    %121 = arith.mulf %105, %113 : vector<8x128xf32>
    %122 = arith.addf %120, %121 : vector<8x128xf32>
    %123 = math.tanh %122 : vector<8x128xf32>
    %124 = arith.mulf %119, %123 : vector<8x128xf32>
    %c32 = arith.constant 32 : index
    %c0_38 = arith.constant 0 : index
    %125 = vector.load %arg8[%c32, %c0_38] : memref<64x512xf32, #tpu.memory_space<vmem>>, vector<8x512xf32>
    %c0_39 = arith.constant 0 : index
    %c0_40 = arith.constant 0 : index
    %126 = vector.load %arg3[%c0_39, %c0_40] : memref<128x512xf32, #tpu.memory_space<vmem>>, vector<128x512xf32>
    %cst_41 = arith.constant dense<0.000000e+00> : vector<8x512xf32>
    %127 = tpu.matmul %124, %126, %cst_41 {dimension_numbers = #tpu.dot_dimension_numbers<[1], [0], [0], [1], [0, 0, 1, 1], [], []>} : vector<8x128xf32>, vector<128x512xf32>, vector<8x512xf32> -> vector<8x512xf32>
    %128 = arith.addf %125, %127 : vector<8x512xf32>
    %129 = vector.extract_strided_slice %128 {offsets = [0, 0], sizes = [8, 128], strides = [1, 1]} : vector<8x512xf32> to vector<8x128xf32>
    %130 = arith.negf %129 : vector<8x128xf32>
    %131 = math.exp %130 : vector<8x128xf32>
    %cst_42 = arith.constant 1.000000e+00 : f32
    %132 = vector.broadcast %cst_42 : f32 to vector<8x128xf32>
    %133 = arith.addf %132, %131 : vector<8x128xf32>
    %134 = arith.divf %132, %133 : vector<8x128xf32>
    %135 = vector.extract_strided_slice %128 {offsets = [0, 128], sizes = [8, 128], strides = [1, 1]} : vector<8x512xf32> to vector<8x128xf32>
    %136 = arith.negf %135 : vector<8x128xf32>
    %137 = math.exp %136 : vector<8x128xf32>
    %cst_43 = arith.constant 1.000000e+00 : f32
    %138 = vector.broadcast %cst_43 : f32 to vector<8x128xf32>
    %139 = arith.addf %138, %137 : vector<8x128xf32>
    %140 = arith.divf %138, %139 : vector<8x128xf32>
    %141 = vector.extract_strided_slice %128 {offsets = [0, 256], sizes = [8, 128], strides = [1, 1]} : vector<8x512xf32> to vector<8x128xf32>
    %142 = math.tanh %141 : vector<8x128xf32>
    %143 = vector.extract_strided_slice %128 {offsets = [0, 384], sizes = [8, 128], strides = [1, 1]} : vector<8x512xf32> to vector<8x128xf32>
    %144 = arith.negf %143 : vector<8x128xf32>
    %145 = math.exp %144 : vector<8x128xf32>
    %cst_44 = arith.constant 1.000000e+00 : f32
    %146 = vector.broadcast %cst_44 : f32 to vector<8x128xf32>
    %147 = arith.addf %146, %145 : vector<8x128xf32>
    %148 = arith.divf %146, %147 : vector<8x128xf32>
    %149 = arith.mulf %140, %122 : vector<8x128xf32>
    %150 = arith.mulf %134, %142 : vector<8x128xf32>
    %151 = arith.addf %149, %150 : vector<8x128xf32>
    %152 = math.tanh %151 : vector<8x128xf32>
    %153 = arith.mulf %148, %152 : vector<8x128xf32>
    %c40 = arith.constant 40 : index
    %c0_45 = arith.constant 0 : index
    %154 = vector.load %arg8[%c40, %c0_45] : memref<64x512xf32, #tpu.memory_space<vmem>>, vector<8x512xf32>
    %c0_46 = arith.constant 0 : index
    %c0_47 = arith.constant 0 : index
    %155 = vector.load %arg3[%c0_46, %c0_47] : memref<128x512xf32, #tpu.memory_space<vmem>>, vector<128x512xf32>
    %cst_48 = arith.constant dense<0.000000e+00> : vector<8x512xf32>
    %156 = tpu.matmul %153, %155, %cst_48 {dimension_numbers = #tpu.dot_dimension_numbers<[1], [0], [0], [1], [0, 0, 1, 1], [], []>} : vector<8x128xf32>, vector<128x512xf32>, vector<8x512xf32> -> vector<8x512xf32>
    %157 = arith.addf %154, %156 : vector<8x512xf32>
    %158 = vector.extract_strided_slice %157 {offsets = [0, 0], sizes = [8, 128], strides = [1, 1]} : vector<8x512xf32> to vector<8x128xf32>
    %159 = arith.negf %158 : vector<8x128xf32>
    %160 = math.exp %159 : vector<8x128xf32>
    %cst_49 = arith.constant 1.000000e+00 : f32
    %161 = vector.broadcast %cst_49 : f32 to vector<8x128xf32>
    %162 = arith.addf %161, %160 : vector<8x128xf32>
    %163 = arith.divf %161, %162 : vector<8x128xf32>
    %164 = vector.extract_strided_slice %157 {offsets = [0, 128], sizes = [8, 128], strides = [1, 1]} : vector<8x512xf32> to vector<8x128xf32>
    %165 = arith.negf %164 : vector<8x128xf32>
    %166 = math.exp %165 : vector<8x128xf32>
    %cst_50 = arith.constant 1.000000e+00 : f32
    %167 = vector.broadcast %cst_50 : f32 to vector<8x128xf32>
    %168 = arith.addf %167, %166 : vector<8x128xf32>
    %169 = arith.divf %167, %168 : vector<8x128xf32>
    %170 = vector.extract_strided_slice %157 {offsets = [0, 256], sizes = [8, 128], strides = [1, 1]} : vector<8x512xf32> to vector<8x128xf32>
    %171 = math.tanh %170 : vector<8x128xf32>
    %172 = vector.extract_strided_slice %157 {offsets = [0, 384], sizes = [8, 128], strides = [1, 1]} : vector<8x512xf32> to vector<8x128xf32>
    %173 = arith.negf %172 : vector<8x128xf32>
    %174 = math.exp %173 : vector<8x128xf32>
    %cst_51 = arith.constant 1.000000e+00 : f32
    %175 = vector.broadcast %cst_51 : f32 to vector<8x128xf32>
    %176 = arith.addf %175, %174 : vector<8x128xf32>
    %177 = arith.divf %175, %176 : vector<8x128xf32>
    %178 = arith.mulf %169, %151 : vector<8x128xf32>
    %179 = arith.mulf %163, %171 : vector<8x128xf32>
    %180 = arith.addf %178, %179 : vector<8x128xf32>
    %181 = math.tanh %180 : vector<8x128xf32>
    %182 = arith.mulf %177, %181 : vector<8x128xf32>
    %c48 = arith.constant 48 : index
    %c0_52 = arith.constant 0 : index
    %183 = vector.load %arg8[%c48, %c0_52] : memref<64x512xf32, #tpu.memory_space<vmem>>, vector<8x512xf32>
    %c0_53 = arith.constant 0 : index
    %c0_54 = arith.constant 0 : index
    %184 = vector.load %arg3[%c0_53, %c0_54] : memref<128x512xf32, #tpu.memory_space<vmem>>, vector<128x512xf32>
    %cst_55 = arith.constant dense<0.000000e+00> : vector<8x512xf32>
    %185 = tpu.matmul %182, %184, %cst_55 {dimension_numbers = #tpu.dot_dimension_numbers<[1], [0], [0], [1], [0, 0, 1, 1], [], []>} : vector<8x128xf32>, vector<128x512xf32>, vector<8x512xf32> -> vector<8x512xf32>
    %186 = arith.addf %183, %185 : vector<8x512xf32>
    %187 = vector.extract_strided_slice %186 {offsets = [0, 0], sizes = [8, 128], strides = [1, 1]} : vector<8x512xf32> to vector<8x128xf32>
    %188 = arith.negf %187 : vector<8x128xf32>
    %189 = math.exp %188 : vector<8x128xf32>
    %cst_56 = arith.constant 1.000000e+00 : f32
    %190 = vector.broadcast %cst_56 : f32 to vector<8x128xf32>
    %191 = arith.addf %190, %189 : vector<8x128xf32>
    %192 = arith.divf %190, %191 : vector<8x128xf32>
    %193 = vector.extract_strided_slice %186 {offsets = [0, 128], sizes = [8, 128], strides = [1, 1]} : vector<8x512xf32> to vector<8x128xf32>
    %194 = arith.negf %193 : vector<8x128xf32>
    %195 = math.exp %194 : vector<8x128xf32>
    %cst_57 = arith.constant 1.000000e+00 : f32
    %196 = vector.broadcast %cst_57 : f32 to vector<8x128xf32>
    %197 = arith.addf %196, %195 : vector<8x128xf32>
    %198 = arith.divf %196, %197 : vector<8x128xf32>
    %199 = vector.extract_strided_slice %186 {offsets = [0, 256], sizes = [8, 128], strides = [1, 1]} : vector<8x512xf32> to vector<8x128xf32>
    %200 = math.tanh %199 : vector<8x128xf32>
    %201 = vector.extract_strided_slice %186 {offsets = [0, 384], sizes = [8, 128], strides = [1, 1]} : vector<8x512xf32> to vector<8x128xf32>
    %202 = arith.negf %201 : vector<8x128xf32>
    %203 = math.exp %202 : vector<8x128xf32>
    %cst_58 = arith.constant 1.000000e+00 : f32
    %204 = vector.broadcast %cst_58 : f32 to vector<8x128xf32>
    %205 = arith.addf %204, %203 : vector<8x128xf32>
    %206 = arith.divf %204, %205 : vector<8x128xf32>
    %207 = arith.mulf %198, %180 : vector<8x128xf32>
    %208 = arith.mulf %192, %200 : vector<8x128xf32>
    %209 = arith.addf %207, %208 : vector<8x128xf32>
    %210 = math.tanh %209 : vector<8x128xf32>
    %211 = arith.mulf %206, %210 : vector<8x128xf32>
    %c56 = arith.constant 56 : index
    %c0_59 = arith.constant 0 : index
    %212 = vector.load %arg8[%c56, %c0_59] : memref<64x512xf32, #tpu.memory_space<vmem>>, vector<8x512xf32>
    %c0_60 = arith.constant 0 : index
    %c0_61 = arith.constant 0 : index
    %213 = vector.load %arg3[%c0_60, %c0_61] : memref<128x512xf32, #tpu.memory_space<vmem>>, vector<128x512xf32>
    %cst_62 = arith.constant dense<0.000000e+00> : vector<8x512xf32>
    %214 = tpu.matmul %211, %213, %cst_62 {dimension_numbers = #tpu.dot_dimension_numbers<[1], [0], [0], [1], [0, 0, 1, 1], [], []>} : vector<8x128xf32>, vector<128x512xf32>, vector<8x512xf32> -> vector<8x512xf32>
    %215 = arith.addf %212, %214 : vector<8x512xf32>
    %216 = vector.extract_strided_slice %215 {offsets = [0, 0], sizes = [8, 128], strides = [1, 1]} : vector<8x512xf32> to vector<8x128xf32>
    %217 = arith.negf %216 : vector<8x128xf32>
    %218 = math.exp %217 : vector<8x128xf32>
    %cst_63 = arith.constant 1.000000e+00 : f32
    %219 = vector.broadcast %cst_63 : f32 to vector<8x128xf32>
    %220 = arith.addf %219, %218 : vector<8x128xf32>
    %221 = arith.divf %219, %220 : vector<8x128xf32>
    %222 = vector.extract_strided_slice %215 {offsets = [0, 128], sizes = [8, 128], strides = [1, 1]} : vector<8x512xf32> to vector<8x128xf32>
    %223 = arith.negf %222 : vector<8x128xf32>
    %224 = math.exp %223 : vector<8x128xf32>
    %cst_64 = arith.constant 1.000000e+00 : f32
    %225 = vector.broadcast %cst_64 : f32 to vector<8x128xf32>
    %226 = arith.addf %225, %224 : vector<8x128xf32>
    %227 = arith.divf %225, %226 : vector<8x128xf32>
    %228 = vector.extract_strided_slice %215 {offsets = [0, 256], sizes = [8, 128], strides = [1, 1]} : vector<8x512xf32> to vector<8x128xf32>
    %229 = math.tanh %228 : vector<8x128xf32>
    %230 = vector.extract_strided_slice %215 {offsets = [0, 384], sizes = [8, 128], strides = [1, 1]} : vector<8x512xf32> to vector<8x128xf32>
    %231 = arith.negf %230 : vector<8x128xf32>
    %232 = math.exp %231 : vector<8x128xf32>
    %cst_65 = arith.constant 1.000000e+00 : f32
    %233 = vector.broadcast %cst_65 : f32 to vector<8x128xf32>
    %234 = arith.addf %233, %232 : vector<8x128xf32>
    %235 = arith.divf %233, %234 : vector<8x128xf32>
    %236 = arith.mulf %227, %209 : vector<8x128xf32>
    %237 = arith.mulf %221, %229 : vector<8x128xf32>
    %238 = arith.addf %236, %237 : vector<8x128xf32>
    %239 = math.tanh %238 : vector<8x128xf32>
    %240 = arith.mulf %235, %239 : vector<8x128xf32>
    %c0_66 = arith.constant 0 : index
    %c0_67 = arith.constant 0 : index
    %241 = vector.load %arg5[%c0_66, %c0_67] : memref<128x1xf32, #tpu.memory_space<vmem>>, vector<128x1xf32>
    %cst_68 = arith.constant dense<0.000000e+00> : vector<8x1xf32>
    %242 = tpu.matmul %240, %241, %cst_68 {dimension_numbers = #tpu.dot_dimension_numbers<[1], [0], [0], [1], [0, 0, 1, 1], [], []>} : vector<8x128xf32>, vector<128x1xf32>, vector<8x1xf32> -> vector<8x1xf32>
    %c0_69 = arith.constant 0 : index
    %c0_70 = arith.constant 0 : index
    %243 = vector.load %arg6[%c0_69, %c0_70] : memref<1x1xf32, #tpu.memory_space<vmem>>, vector<1x1xf32>
    %244 = vector.broadcast %243 : vector<1x1xf32> to vector<8x1xf32>
    %245 = arith.addf %242, %244 : vector<8x1xf32>
    %246 = arith.negf %245 : vector<8x1xf32>
    %247 = math.exp %246 : vector<8x1xf32>
    %cst_71 = arith.constant 1.000000e+00 : f32
    %248 = vector.broadcast %cst_71 : f32 to vector<8x1xf32>
    %249 = arith.addf %248, %247 : vector<8x1xf32>
    %250 = arith.divf %248, %249 : vector<8x1xf32>
    %c0_72 = arith.constant 0 : index
    %c0_73 = arith.constant 0 : index
    %251 = vector.load %arg7[%c0_72, %c0_73] : memref<8x1xf32, #tpu.memory_space<vmem>>, vector<8x1xf32>
    tpu.vector_store %arg7[%c0_72, %c0_73], %250 {strides = array<i32>} : memref<8x1xf32, #tpu.memory_space<vmem>>, vector<8x1xf32>,
    return
  }
  func.func @transform_0(%arg0: i32) -> (i32, i32) {
    %c0_i32 = arith.constant 0 : i32
    %c0_i32_0 = arith.constant 0 : i32
    %c0_i32_1 = arith.constant 0 : i32
    return %c0_i32, %c0_i32_0 : i32, i32
  }
  func.func @transform_1(%arg0: i32) -> (i32, i32) {
    %c0_i32 = arith.constant 0 : i32
    %c0_i32_0 = arith.constant 0 : i32
    %c0_i32_1 = arith.constant 0 : i32
    return %c0_i32, %c0_i32_0 : i32, i32
  }
  func.func @transform_2(%arg0: i32) -> (i32, i32) {
    %c0_i32 = arith.constant 0 : i32
    %c0_i32_0 = arith.constant 0 : i32
    %c0_i32_1 = arith.constant 0 : i32
    return %c0_i32, %c0_i32_0 : i32, i32
  }
  func.func @transform_3(%arg0: i32) -> (i32, i32) {
    %c0_i32 = arith.constant 0 : i32
    %c0_i32_0 = arith.constant 0 : i32
    %c0_i32_1 = arith.constant 0 : i32
    return %c0_i32, %c0_i32_0 : i32, i32
  }
  func.func @transform_4(%arg0: i32) -> (i32, i32) {
    %c0_i32 = arith.constant 0 : i32
    %c0_i32_0 = arith.constant 0 : i32
    %c0_i32_1 = arith.constant 0 : i32
    return %c0_i32, %c0_i32_0 : i32, i32
  }
  func.func @transform_5(%arg0: i32) -> (i32, i32) {
    %c0_i32 = arith.constant 0 : i32
    %c0_i32_0 = arith.constant 0 : i32
    %c0_i32_1 = arith.constant 0 : i32
    return %c0_i32, %c0_i32_0 : i32, i32
  }
  func.func @transform_6(%arg0: i32) -> (i32, i32) {
    %c0_i32 = arith.constant 0 : i32
    %c0_i32_0 = arith.constant 0 : i32
    %c0_i32_1 = arith.constant 0 : i32
    return %c0_i32, %c0_i32_0 : i32, i32
  }
}

</mosaic_0001>

<bundles_post_ra>
// kernel: lstm_forward.1
= control target key start
LH: loop header
LB: loop body
LE: loop exit
PB: predicated region body
PF: predicated region fallthrough
CT: control target
= control target key end

     0   :  { %v2744_v3 = vmov 0.0   ;;  %vm63_vm0 = vcmask 130048   ;;  %vm2746_vm1 = vmmov 0   ;;  %vm1901_vm2 = vcmask 7168   ;;  %s3518_s1 = inlined_call_operand.vmem [shape: f32[16,512], index: 1, kind: input, shape index: {}]   ;;  %s3519_s0 = inlined_call_operand.vmem [shape: f32[64,16], index: 0, kind: input, shape index: {}]   ;;  %s3520_s2 = inlined_call_operand.vmem [shape: f32[128,512], index: 2, kind: input, shape index: {}]   ;;  %s3521_s3 = inlined_call_operand.vmem [shape: f32[1,512], index: 3, kind: input, shape index: {}]   ;;  %s3522_s4 = inlined_call_operand.vmem [shape: f32[128,1], index: 4, kind: input, shape index: {}]   ;;  %s3523_s5 = inlined_call_operand.<no memory space> [shape: f32[1,1], index: 5, kind: input, shape index: {}]   ;;  %s3524_s6 = inlined_call_operand.vmem [shape: f32[8,1], index: 6, kind: output, shape index: {}]  }
   0x1   :  { %v34_v0 = vld [vmem:[%s3518_s1 + $0x8] sm:$0xff]  ;;  %v36_v2 = vld [vmem:[%s3518_s1 + $0x18] sm:$0xff]  ;;  %152 = vmatprep.mubr.f32.mxu0 %v2744_v3  ;;  %265 = vmatprep.mubr.f32.mxu1 %v2744_v3  ;;  %v33_v6 = vld [vmem:[%s3518_s1] sm:$0xff] }
   0x2   :  { %v38_v1 = vld [vmem:[%s3518_s1 + $0x28] sm:$0xff]  ;;  %v40_v5 = vld [vmem:[%s3518_s1 + $0x38] sm:$0xff]  ;;  %v37_v7 = vld [vmem:[%s3518_s1 + $0x20] sm:$0xff] }
   0x3   :  { %v2001_v4 = vpack.c.bf16 %v38_v1, %v34_v0  ;;  %v2005_v8 = vpack.c.bf16 %v40_v5, %v36_v2  ;;  %v2003_v9 = vpack.c.bf16 %v37_v7, %v33_v6  ;;  %v35_v10 = vld [vmem:[%s3518_s1 + $0x10] sm:$0xff]  ;;  %v25_v12 = vld [vmem:[%s3519_s0] sm:$0xff]  ;;  %v351_v14 = vld [vmem:[%s3520_s2 + $0x8] sm:$0xff] }
   0x4   :  { %v39_v11 = vld [vmem:[%s3518_s1 + $0x30] sm:$0xff]  ;;  %v355_v15 = vld [vmem:[%s3520_s2 + $0x28] sm:$0xff]  ;;  %v353_v16 = vld [vmem:[%s3520_s2 + $0x18] sm:$0xff] }
   0x5   :  { %2002 = vmatprep.subr.bf16.mxu0 %v2001_v4  ;;  %v2007_v13 = vpack.c.bf16 %v39_v11, %v35_v10  ;;  %2006 = vmatprep.subr.bf16.mxu1 %v2005_v8  ;;  %v2820_v17 = vpack.c.bf16 %v355_v15, %v351_v14  ;;  %v357_v18 = vld [vmem:[%s3520_s2 + $0x38] sm:$0xff]  ;;  %v350_v19 = vld [vmem:[%s3520_s2] sm:$0xff]  ;;  %v352_v23 = vld [vmem:[%s3520_s2 + $0x10] sm:$0xff] }
   0x6   :  { %2004 = vmatpush1.bf16.msra.mxu0 %v2003_v9  ;;  %v354_v20 = vld [vmem:[%s3520_s2 + $0x20] sm:$0xff]  ;;  %v2831_v21 = vpack.c.bf16 %v357_v18, %v353_v16  ;;  %v356_v24 = vld [vmem:[%s3520_s2 + $0x30] sm:$0xff]  ;;  %v359_v26 = vld [vmem:[%s3520_s2 + $0x48] sm:$0xff] }
   0x7   :  { %2008 = vmatpush1.bf16.msra.mxu1 %v2007_v13  ;;  %v2833_v22 = vpack.c.bf16 %v354_v20, %v350_v19  ;;  %2010 = vmatprep.subr.bf16.mxu0 %v2820_v17  ;;  %v2842_v25 = vpack.c.bf16 %v356_v24, %v352_v23  ;;  %v363_v27 = vld [vmem:[%s3520_s2 + $0x68] sm:$0xff]  ;;  %v361_v28 = vld [vmem:[%s3520_s2 + $0x58] sm:$0xff]  ;;  %v358_v31 = vld [vmem:[%s3520_s2 + $0x40] sm:$0xff] }
   0x8   :  { %2042 = vmatprep.subr.bf16.mxu1 %v2831_v21  ;;  %v2855_v29 = vpack.c.bf16 %v363_v27, %v359_v26  ;;  %v365_v30 = vld [vmem:[%s3520_s2 + $0x78] sm:$0xff]  ;;  %v362_v32 = vld [vmem:[%s3520_s2 + $0x60] sm:$0xff]  ;;  %v26_v33 = vld [vmem:[%s3519_s0 + $0x8] sm:$0xff] }
   0x9   :  { %1907 = vmatmul.mubr.msk.f32.vlgmr.msra.gmra.mrb[0].mxu0 %vm63_vm0, %v25_v12  ;;  %v2871_v34 = vpack.c.bf16 %v365_v30, %v361_v28  ;;  %v2873_v35 = vpack.c.bf16 %v362_v32, %v358_v31  ;;  %v360_v36 = vld [vmem:[%s3520_s2 + $0x50] sm:$0xff]  ;;  %v367_v39 = vld [vmem:[%s3520_s2 + $0x88] sm:$0xff]  ;;  %v369_v41 = vld [vmem:[%s3520_s2 + $0x98] sm:$0xff] }
   0xa   :  { %1915 = vmatmul.mubr.msk.f32.vlgmr.msra.gmra.mrb[0].mxu1 %vm63_vm0, %v25_v12  ;;  %2012 = vmatpush1.bf16.msra.mxu0 %v2833_v22  ;;  %v364_v37 = vld [vmem:[%s3520_s2 + $0x70] sm:$0xff]  ;;  %v371_v40 = vld [vmem:[%s3520_s2 + $0xa8] sm:$0xff]  ;;  %v373_v43 = vld [vmem:[%s3520_s2 + $0xb8] sm:$0xff] }
   0xb   :  { %2044 = vmatpush1.bf16.msra.mxu1 %v2842_v25  ;;  %158 = vmatprep.mubr.f32.mxu0 %v2744_v3  ;;  %v2883_v38 = vpack.c.bf16 %v364_v37, %v360_v36  ;;  %v2896_v42 = vpack.c.bf16 %v371_v40, %v367_v39  ;;  %v366_v44 = vld [vmem:[%s3520_s2 + $0x80] sm:$0xff]  ;;  %v27_v46 = vld [vmem:[%s3519_s0 + $0x10] sm:$0xff]  ;;  %v2912_v47 = vpack.c.bf16 %v373_v43, %v369_v41  ;;  %v375_v51 = vld [vmem:[%s3520_s2 + $0xc8] sm:$0xff] }
   0xc   :  { %271 = vmatprep.mubr.f32.mxu1 %v2744_v3  ;;  %2014 = vmatprep.subr.bf16.mxu0 %v2855_v29  ;;  %v370_v45 = vld [vmem:[%s3520_s2 + $0xa0] sm:$0xff]  ;;  %v368_v48 = vld [vmem:[%s3520_s2 + $0x90] sm:$0xff]  ;;  %v379_v52 = vld [vmem:[%s3520_s2 + $0xe8] sm:$0xff] }
   0xd   :  { %1908 = vmatmul.mubr.msk.f32.gmra.mrb[2].mxu0 %vm63_vm0, %v26_v33  ;;  %2046 = vmatprep.subr.bf16.mxu1 %v2871_v34  ;;  %v372_v49 = vld [vmem:[%s3520_s2 + $0xb0] sm:$0xff]  ;;  %v2922_v50 = vpack.c.bf16 %v370_v45, %v366_v44  ;;  %v377_v53 = vld [vmem:[%s3520_s2 + $0xd8] sm:$0xff]  ;;  %v374_v56 = vld [vmem:[%s3520_s2 + $0xc0] sm:$0xff]  ;;  %v2948_v58 = vpack.c.bf16 %v379_v52, %v375_v51 }
   0xe   :  { %1916 = vmatmul.mubr.msk.f32.gmra.mrb[2].mxu1 %vm63_vm0, %v26_v33  ;;  %2016 = vmatpush1.bf16.msra.mxu0 %v2873_v35  ;;  %v2935_v54 = vpack.c.bf16 %v372_v49, %v368_v48  ;;  %v381_v55 = vld [vmem:[%s3520_s2 + $0xf8] sm:$0xff]  ;;  %v378_v57 = vld [vmem:[%s3520_s2 + $0xe0] sm:$0xff]  ;;  %v376_v59 = vld [vmem:[%s3520_s2 + $0xd0] sm:$0xff] }
   0xf   :  { %2048 = vmatpush1.bf16.msra.mxu1 %v2883_v38  ;;  %164 = vmatprep.mubr.f32.mxu0 %v2744_v3  ;;  %v380_v60 = vld [vmem:[%s3520_s2 + $0xf0] sm:$0xff]  ;;  %v2958_v61 = vpack.c.bf16 %v381_v55, %v377_v53  ;;  %v383_v62 = vld [vmem:[%s3520_s2 + $0x108] sm:$0xff]  ;;  %v28_v0 = vld [vmem:[%s3519_s0 + $0x18] sm:$0xff]  ;;  %v2971_v1 = vpack.c.bf16 %v378_v57, %v374_v56 }
  0x10   :  { %277 = vmatprep.mubr.f32.mxu1 %v2744_v3  ;;  %2018 = vmatprep.subr.bf16.mxu0 %v2896_v42  ;;  %v387_v63 = vld [vmem:[%s3520_s2 + $0x128] sm:$0xff]  ;;  %v385_v2 = vld [vmem:[%s3520_s2 + $0x118] sm:$0xff]  ;;  %v2981_v5 = vpack.c.bf16 %v380_v60, %v376_v59  ;;  %v382_v6 = vld [vmem:[%s3520_s2 + $0x100] sm:$0xff] }
  0x11   :  { %1909 = vmatmul.mubr.msk.f32.gmra.mrb[4].mxu0 %vm63_vm0, %v27_v46  ;;  %2050 = vmatprep.subr.bf16.mxu1 %v2912_v47  ;;  %v389_v4 = vld [vmem:[%s3520_s2 + $0x138] sm:$0xff]  ;;  %v386_v7 = vld [vmem:[%s3520_s2 + $0x120] sm:$0xff]  ;;  %v2991_v8 = vpack.c.bf16 %v387_v63, %v383_v62  ;;  %v384_v9 = vld [vmem:[%s3520_s2 + $0x110] sm:$0xff] }
  0x12   :  { %1917 = vmatmul.mubr.msk.f32.gmra.mrb[4].mxu1 %vm63_vm0, %v27_v46  ;;  %2020 = vmatpush1.bf16.msra.mxu0 %v2922_v50  ;;  %v388_v10 = vld [vmem:[%s3520_s2 + $0x130] sm:$0xff]  ;;  %v3001_v11 = vpack.c.bf16 %v389_v4, %v385_v2  ;;  %v391_v12 = vld [vmem:[%s3520_s2 + $0x148] sm:$0xff]  ;;  %v29_v14 = vld [vmem:[%s3519_s0 + $0x20] sm:$0xff]  ;;  %v3014_v15 = vpack.c.bf16 %v386_v7, %v382_v6  ;;  %v43_v7 = vlaneseq }
  0x13   :  { %2052 = vmatpush1.bf16.msra.mxu1 %v2935_v54  ;;  %170 = vmatprep.mubr.f32.mxu0 %v2744_v3  ;;  %v395_v13 = vld [vmem:[%s3520_s2 + $0x168] sm:$0xff]  ;;  %v393_v16 = vld [vmem:[%s3520_s2 + $0x158] sm:$0xff]  ;;  %v3024_v19 = vpack.c.bf16 %v388_v10, %v384_v9  ;;  %v390_v20 = vld [vmem:[%s3520_s2 + $0x140] sm:$0xff] }
  0x14   :  { %283 = vmatprep.mubr.f32.mxu1 %v2744_v3  ;;  %2022 = vmatprep.subr.bf16.mxu0 %v2948_v58  ;;  %v397_v18 = vld [vmem:[%s3520_s2 + $0x178] sm:$0xff]  ;;  %v394_v23 = vld [vmem:[%s3520_s2 + $0x160] sm:$0xff]  ;;  %v3034_v24 = vpack.c.bf16 %v395_v13, %v391_v12  ;;  %v392_v26 = vld [vmem:[%s3520_s2 + $0x150] sm:$0xff]  ;;  %v44_v9 = vshrl.u32 %v43_v7, 7 }
  0x15   :  { %1910 = vmatmul.mubr.msk.f32.gmra.mrb[6].mxu0 %vm63_vm0, %v28_v0  ;;  %2054 = vmatprep.subr.bf16.mxu1 %v2958_v61  ;;  %v396_v27 = vld [vmem:[%s3520_s2 + $0x170] sm:$0xff]  ;;  %v3044_v28 = vpack.c.bf16 %v397_v18, %v393_v16  ;;  %v399_v30 = vld [vmem:[%s3520_s2 + $0x188] sm:$0xff]  ;;  %v3057_v33 = vpack.c.bf16 %v394_v23, %v390_v20  ;;  %v401_v36 = vld [vmem:[%s3520_s2 + $0x198] sm:$0xff] }
  0x16   :  { %1918 = vmatmul.mubr.msk.f32.gmra.mrb[6].mxu1 %vm63_vm0, %v28_v0  ;;  %2024 = vmatpush1.bf16.msra.mxu0 %v2971_v1  ;;  %v403_v31 = vld [vmem:[%s3520_s2 + $0x1a8] sm:$0xff]  ;;  %v405_v37 = vld [vmem:[%s3520_s2 + $0x1b8] sm:$0xff]  ;;  %v3067_v39 = vpack.c.bf16 %v396_v27, %v392_v26  ;;  %v398_v40 = vld [vmem:[%s3520_s2 + $0x180] sm:$0xff]  ;;  %v45_v10 = vsub.s32 0, %v44_v9  ;;  %v49_v13 = vsub.s32 1, %v44_v9  ;;  %v57_v20 = vsub.s32 3, %v44_v9 }
  0x17   :  { %2056 = vmatpush1.bf16.msra.mxu1 %v2981_v5  ;;  %176 = vmatprep.mubr.f32.mxu0 %v2744_v3  ;;  %v30_v32 = vld [vmem:[%s3519_s0 + $0x28] sm:$0xff]  ;;  %v402_v41 = vld [vmem:[%s3520_s2 + $0x1a0] sm:$0xff]  ;;  %v3077_v43 = vpack.c.bf16 %v403_v31, %v399_v30  ;;  %v400_v44 = vld [vmem:[%s3520_s2 + $0x190] sm:$0xff]  ;;  %v3087_v46 = vpack.c.bf16 %v405_v37, %v401_v36 }
  0x18   :  { %289 = vmatprep.mubr.f32.mxu1 %v2744_v3  ;;  %2026 = vmatprep.subr.bf16.mxu0 %v2991_v8  ;;  %v404_v45 = vld [vmem:[%s3520_s2 + $0x1b0] sm:$0xff]  ;;  %v407_v48 = vld [vmem:[%s3520_s2 + $0x1c8] sm:$0xff]  ;;  %v3100_v52 = vpack.c.bf16 %v402_v41, %v398_v40  ;;  %v409_v53 = vld [vmem:[%s3520_s2 + $0x1d8] sm:$0xff]  ;;  %v53_v40 = vsub.s32 2, %v44_v9 }
  0x19   :  { %1911 = vmatmul.mubr.msk.f32.gmra.mrb[8].mxu0 %vm63_vm0, %v29_v14  ;;  %2058 = vmatprep.subr.bf16.mxu1 %v3001_v11  ;;  %v411_v49 = vld [vmem:[%s3520_s2 + $0x1e8] sm:$0xff]  ;;  %v31_v51 = vld [vmem:[%s3519_s0 + $0x30] sm:$0xff]  ;;  %v413_v55 = vld [vmem:[%s3520_s2 + $0x1f8] sm:$0xff]  ;;  %v3110_v56 = vpack.c.bf16 %v404_v45, %v400_v44 }
  0x1a   :  { %1919 = vmatmul.mubr.msk.f32.gmra.mrb[8].mxu1 %vm63_vm0, %v29_v14  ;;  %2028 = vmatpush1.bf16.msra.mxu0 %v3014_v15  ;;  %v406_v57 = vld [vmem:[%s3520_s2 + $0x1c0] sm:$0xff]  ;;  %v3120_v60 = vpack.c.bf16 %v411_v49, %v407_v48  ;;  %v408_v62 = vld [vmem:[%s3520_s2 + $0x1d0] sm:$0xff]  ;;  %v3130_v0 = vpack.c.bf16 %v413_v55, %v409_v53  ;;  %v32_v2 = vld [vmem:[%s3519_s0 + $0x38] sm:$0xff] }
  0x1b   :  { %2060 = vmatpush1.bf16.msra.mxu1 %v3024_v19  ;;  %182 = vmatprep.mubr.f32.mxu0 %v2744_v3  ;;  %v410_v59 = vld [vmem:[%s3520_s2 + $0x1e0] sm:$0xff]  ;;  %v412_v63 = vld [vmem:[%s3520_s2 + $0x1f0] sm:$0xff] }
  0x1c   :  { %295 = vmatprep.mubr.f32.mxu1 %v2744_v3  ;;  %2030 = vmatprep.subr.bf16.mxu0 %v3034_v24  ;;  %v3137_v4 = vpack.c.bf16 %v410_v59, %v406_v57  ;;  %v3141_v6 = vpack.c.bf16 %v412_v63, %v408_v62  ;;  %v41_v12 = vld [vmem:[%s3521_s3] sm:$0xf] }
  0x1d   :  { %1912 = vmatmul.mubr.msk.f32.gmra.mrb[10].mxu0 %vm63_vm0, %v30_v32  ;;  %2062 = vmatprep.subr.bf16.mxu1 %v3044_v28  ;;  %v3193_v14 = vrot.slane %v41_v12, %v45_v10  ;;  %v3195_v16 = vrot.slane %v41_v12, %v49_v13  ;;  %v3199_v37 = vrot.slane %v41_v12, %v57_v20 }
  0x1e   :  { %1920 = vmatmul.mubr.msk.f32.gmra.mrb[10].mxu1 %vm63_vm0, %v30_v32  ;;  %2032 = vmatpush1.bf16.msra.mxu0 %v3057_v33  ;;  %v3202_v44 = vrot.slane %v41_v12, %v53_v40 }
  0x1f   :  { %2064 = vmatpush1.bf16.msra.mxu1 %v3067_v39  ;;  %188 = vmatprep.mubr.f32.mxu0 %v2744_v3 }
  0x20   :  { %301 = vmatprep.mubr.f32.mxu1 %v2744_v3  ;;  %2034 = vmatprep.subr.bf16.mxu0 %v3077_v43 }
  0x21   :  { %1913 = vmatmul.mubr.msk.f32.gmra.mrb[12].mxu0 %vm63_vm0, %v31_v51  ;;  %2066 = vmatprep.subr.bf16.mxu1 %v3087_v46 }
  0x22   :  { %1921 = vmatmul.mubr.msk.f32.gmra.mrb[12].mxu1 %vm63_vm0, %v31_v51  ;;  %2036 = vmatpush1.bf16.msra.mxu0 %v3100_v52 }
  0x23   :  { %2068 = vmatpush1.bf16.msra.mxu1 %v3110_v56  ;;  %194 = vmatprep.mubr.f32.mxu0 %v2744_v3 }
  0x24   :  { %307 = vmatprep.mubr.f32.mxu1 %v2744_v3  ;;  %2038 = vmatprep.subr.bf16.mxu0 %v3120_v60 }
  0x25   :  { %1914 = vmatmul.mubr.msk.f32.gmra.mrb[14].mxu0 %vm63_vm0, %v32_v2  ;;  %2070 = vmatprep.subr.bf16.mxu1 %v3130_v0 }
  0x26   :  { %1922 = vmatmul.mubr.msk.f32.gmra.mrb[14].mxu1 %vm63_vm0, %v32_v2  ;;  %2040 = vmatpush1.bf16.msra.mxu0 %v3137_v4 }
  0x27   :  { %2072 = vmatpush1.bf16.msra.mxu1 %v3141_v6  ;;  %478 = vmatprep.mubr.f32.mxu0 %v2744_v3 }
  0x28   :  { %549 = vmatprep.mubr.f32.mxu1 %v2744_v3  ;;  %2074 = vmatprep.subr.bf16.mxu0 %v2820_v17 }
  0x29   :  { %479 = vmatmul.mubr.f32.vlgmr.msra.gmra.mrb[0].mxu0 %v2744_v3  ;;  %2106 = vmatprep.subr.bf16.mxu1 %v2831_v21 }
  0x2a   :  { %550 = vmatmul.mubr.f32.vlgmr.msra.gmra.mrb[0].mxu1 %v2744_v3  ;;  %2076 = vmatpush1.bf16.msra.mxu0 %v2833_v22 }
  0x2b   :  { %2108 = vmatpush1.bf16.msra.mxu1 %v2842_v25  ;;  %2078 = vmatprep.subr.bf16.mxu0 %v2855_v29 }
  0x2c   :  { %2110 = vmatprep.subr.bf16.mxu1 %v2871_v34  ;;  %652 = vmatprep.mubr.f32.mxu0 %v2744_v3 }
  0x2d   :  { %723 = vmatprep.mubr.f32.mxu1 %v2744_v3 }
  0x2e   :  { %2080 = vmatpush1.bf16.msra.mxu0 %v2873_v35 }
  0x2f   :  { %2112 = vmatpush1.bf16.msra.mxu1 %v2883_v38  ;;  %2082 = vmatprep.subr.bf16.mxu0 %v2896_v42 }
  0x30   :  { %2114 = vmatprep.subr.bf16.mxu1 %v2912_v47 }
  0x32   :  { %2084 = vmatpush1.bf16.msra.mxu0 %v2922_v50 }
  0x33   :  { %2116 = vmatpush1.bf16.msra.mxu1 %v2935_v54  ;;  %2086 = vmatprep.subr.bf16.mxu0 %v2948_v58 }
  0x34   :  { %2118 = vmatprep.subr.bf16.mxu1 %v2958_v61 }
  0x36   :  { %2088 = vmatpush1.bf16.msra.mxu0 %v2971_v1 }
  0x37   :  { %2120 = vmatpush1.bf16.msra.mxu1 %v2981_v5  ;;  %2090 = vmatprep.subr.bf16.mxu0 %v2991_v8 }
  0x38   :  { %2122 = vmatprep.subr.bf16.mxu1 %v3001_v11 }
  0x3a   :  { %2092 = vmatpush1.bf16.msra.mxu0 %v3014_v15 }
  0x3b   :  { %2124 = vmatpush1.bf16.msra.mxu1 %v3024_v19  ;;  %2094 = vmatprep.subr.bf16.mxu0 %v3034_v24 }
  0x3c   :  { %2126 = vmatprep.subr.bf16.mxu1 %v3044_v28 }
  0x3e   :  { %2096 = vmatpush1.bf16.msra.mxu0 %v3057_v33 }
  0x3f   :  { %2128 = vmatpush1.bf16.msra.mxu1 %v3067_v39  ;;  %2098 = vmatprep.subr.bf16.mxu0 %v3077_v43 }
  0x40   :  { %2130 = vmatprep.subr.bf16.mxu1 %v3087_v46 }
  0x42   :  { %2100 = vmatpush1.bf16.msra.mxu0 %v3100_v52 }
  0x43   :  { %2132 = vmatpush1.bf16.msra.mxu1 %v3110_v56  ;;  %2102 = vmatprep.subr.bf16.mxu0 %v3120_v60 }
  0x44   :  { %2134 = vmatprep.subr.bf16.mxu1 %v3130_v0 }
  0x46   :  { %2104 = vmatpush1.bf16.msra.mxu0 %v3137_v4 }
  0x47   :  { %2136 = vmatpush1.bf16.msra.mxu1 %v3141_v6  ;;  %2138 = vmatprep.subr.bf16.mxu0 %v2820_v17 }
  0x48   :  { %2170 = vmatprep.subr.bf16.mxu1 %v2831_v21 }
  0xfc   :  { %v480_v18 = vpop.f32.mrb[0].mxu0 }
  0xfd   :  { %v2545_v23 = vadd.f32 %v480_v18, %v3193_v14  ;;  %v551_v26 = vpop.f32.mrb[0].mxu1  ;;  %v482_v27 = vpop.f32.mrb[1].mxu0 }
  0xfe   :  { %v2546_v30 = vadd.f32 %v482_v27, %v3195_v16  ;;  %v553_v31 = vpop.f32.mrb[1].mxu1  ;;  %v2561_v48 = vadd.f32 %v551_v26, %v3202_v44 }
  0xff   :  { %v1923_v32 = vmul.f32 -1.442695, %v2545_v23  ;;  %v2562_v41 = vadd.f32 %v553_v31, %v3199_v37 }
 0x100   :  { %v1924_v36 = vmul.f32 -1.442695, %v2546_v30 }
 0x101   :  { %2612 = vpow2.f32 %v1923_v32  ;;  %v1925_v45 = vmul.f32 -1.442695, %v2562_v41 }
 0x102   :  { %2614 = vpow2.f32 %v1924_v36 }
 0x103   :  { %2616 = vpow2.f32 %v1925_v45 }
 0x104   :  { %2618 = vtanh.f32 %v2561_v48 }
 0x10b   :  { %v2613_v49 = vpop.eup %2612 }
 0x10c   :  { %v2615_v51 = vpop.eup %2614  ;;  %v563_v53 = vadd.f32 1.0, %v2613_v49 }
 0x10d   :  { %v569_v55 = vadd.f32 1.0, %v2615_v51  ;;  %v2617_v57 = vpop.eup %2616 }
 0x10e   :  { %2620 = vrcp.f32 %v563_v53  ;;  %v2619_v59 = vpop.eup %2618  ;;  %v576_v7 = vadd.f32 1.0, %v2617_v57 }
 0x10f   :  { %2622 = vrcp.f32 %v569_v55 }
 0x110   :  { %2624 = vrcp.f32 %v576_v7 }
 0x118   :  { %v2621_v62 = vpop.eup %2620 }
 0x119   :  { %v2623_v63 = vpop.eup %2622  ;;  %v580_v2 = vmul.f32 %v2621_v62, %v2619_v59 }
 0x11a   :  { %v579_v9 = vmul.f32 0.0, %v2623_v63  ;;  %v2625_v12 = vpop.eup %2624 }
 0x11c   :  { %v3205_v10 = vadd.f32 %v580_v2, %v579_v9 }
 0x11e   :  { %2626 = vtanh.f32 %v3205_v10 }
 0x128   :  { %v2627_v13 = vpop.eup %2626 }
 0x129   :  { %v583_v18 = vmul.f32 %v2627_v13, %v2625_v12 }
 0x12b   :  { %653 = vmatmul.mubr.f32.vlgmr.msra.gmra.mrb[2].mxu0 %v583_v18  ;;  %724 = vmatmul.mubr.f32.vlgmr.msra.gmra.mrb[2].mxu1 %v583_v18 }
 0x12c   :  { %2140 = vmatpush1.bf16.msra.mxu0 %v2833_v22  ;;  %2172 = vmatpush1.bf16.msra.mxu1 %v2842_v25 }
 0x12d   :  { %2142 = vmatprep.subr.bf16.mxu0 %v2855_v29  ;;  %2174 = vmatprep.subr.bf16.mxu1 %v2871_v34 }
 0x12e   :  { %826 = vmatprep.mubr.f32.mxu0 %v2744_v3  ;;  %897 = vmatprep.mubr.f32.mxu1 %v2744_v3 }
 0x130   :  { %2144 = vmatpush1.bf16.msra.mxu0 %v2873_v35  ;;  %2176 = vmatpush1.bf16.msra.mxu1 %v2883_v38 }
 0x131   :  { %2146 = vmatprep.subr.bf16.mxu0 %v2896_v42  ;;  %2178 = vmatprep.subr.bf16.mxu1 %v2912_v47 }
 0x134   :  { %2148 = vmatpush1.bf16.msra.mxu0 %v2922_v50  ;;  %2180 = vmatpush1.bf16.msra.mxu1 %v2935_v54 }
 0x135   :  { %2150 = vmatprep.subr.bf16.mxu0 %v2948_v58  ;;  %2182 = vmatprep.subr.bf16.mxu1 %v2958_v61 }
 0x138   :  { %2152 = vmatpush1.bf16.msra.mxu0 %v2971_v1  ;;  %2184 = vmatpush1.bf16.msra.mxu1 %v2981_v5 }
 0x139   :  { %2154 = vmatprep.subr.bf16.mxu0 %v2991_v8  ;;  %2186 = vmatprep.subr.bf16.mxu1 %v3001_v11 }
 0x13c   :  { %2156 = vmatpush1.bf16.msra.mxu0 %v3014_v15  ;;  %2188 = vmatpush1.bf16.msra.mxu1 %v3024_v19 }
 0x13d   :  { %2158 = vmatprep.subr.bf16.mxu0 %v3034_v24  ;;  %2190 = vmatprep.subr.bf16.mxu1 %v3044_v28 }
 0x140   :  { %2160 = vmatpush1.bf16.msra.mxu0 %v3057_v33  ;;  %2192 = vmatpush1.bf16.msra.mxu1 %v3067_v39 }
 0x141   :  { %2162 = vmatprep.subr.bf16.mxu0 %v3077_v43  ;;  %2194 = vmatprep.subr.bf16.mxu1 %v3087_v46 }
 0x144   :  { %2164 = vmatpush1.bf16.msra.mxu0 %v3100_v52  ;;  %2196 = vmatpush1.bf16.msra.mxu1 %v3110_v56 }
 0x145   :  { %2166 = vmatprep.subr.bf16.mxu0 %v3120_v60  ;;  %2198 = vmatprep.subr.bf16.mxu1 %v3130_v0 }
 0x148   :  { %2168 = vmatpush1.bf16.msra.mxu0 %v3137_v4  ;;  %2200 = vmatpush1.bf16.msra.mxu1 %v3141_v6 }
 0x149   :  { %2202 = vmatprep.subr.bf16.mxu0 %v2820_v17  ;;  %2234 = vmatprep.subr.bf16.mxu1 %v2831_v21 }
 0x1fe   :  { %v654_v20 = vpop.f32.mrb[2].mxu0  ;;  %v725_v23 = vpop.f32.mrb[2].mxu1 }
 0x1ff   :  { %v2547_v26 = vadd.f32 %v654_v20, %v3193_v14  ;;  %v656_v27 = vpop.f32.mrb[3].mxu0  ;;  %v727_v30 = vpop.f32.mrb[3].mxu1  ;;  %v2563_v45 = vadd.f32 %v725_v23, %v3202_v44 }
 0x200   :  { %v2548_v31 = vadd.f32 %v656_v27, %v3195_v16  ;;  %v2564_v40 = vadd.f32 %v727_v30, %v3199_v37 }
 0x201   :  { %v1926_v32 = vmul.f32 -1.442695, %v2547_v26 }
 0x202   :  { %v1927_v36 = vmul.f32 -1.442695, %v2548_v31  ;;  %v1928_v41 = vmul.f32 -1.442695, %v2564_v40 }
 0x203   :  { %2628 = vpow2.f32 %v1926_v32 }
 0x204   :  { %2630 = vpow2.f32 %v1927_v36 }
 0x205   :  { %2632 = vpow2.f32 %v1928_v41 }
 0x206   :  { %2634 = vtanh.f32 %v2563_v45 }
 0x20d   :  { %v2629_v48 = vpop.eup %2628 }
 0x20e   :  { %v2631_v49 = vpop.eup %2630  ;;  %v737_v51 = vadd.f32 1.0, %v2629_v48 }
 0x20f   :  { %v743_v53 = vadd.f32 1.0, %v2631_v49  ;;  %v2633_v55 = vpop.eup %2632 }
 0x210   :  { %2636 = vrcp.f32 %v737_v51  ;;  %v2635_v57 = vpop.eup %2634  ;;  %v750_v2 = vadd.f32 1.0, %v2633_v55 }
 0x211   :  { %2638 = vrcp.f32 %v743_v53 }
 0x212   :  { %2640 = vrcp.f32 %v750_v2 }
 0x21a   :  { %v2637_v59 = vpop.eup %2636 }
 0x21b   :  { %v2639_v62 = vpop.eup %2638  ;;  %v754_v63 = vmul.f32 %v2637_v59, %v2635_v57 }
 0x21c   :  { %v753_v7 = vmul.f32 %v2639_v62, %v3205_v10  ;;  %v2641_v12 = vpop.eup %2640 }
 0x21e   :  { %v3247_v9 = vadd.f32 %v754_v63, %v753_v7 }
 0x220   :  { %2642 = vtanh.f32 %v3247_v9 }
 0x22a   :  { %v2643_v13 = vpop.eup %2642 }
 0x22b   :  { %v757_v18 = vmul.f32 %v2643_v13, %v2641_v12 }
 0x22d   :  { %827 = vmatmul.mubr.f32.vlgmr.msra.gmra.mrb[4].mxu0 %v757_v18  ;;  %898 = vmatmul.mubr.f32.vlgmr.msra.gmra.mrb[4].mxu1 %v757_v18 }
 0x22e   :  { %2204 = vmatpush1.bf16.msra.mxu0 %v2833_v22  ;;  %2236 = vmatpush1.bf16.msra.mxu1 %v2842_v25 }
 0x22f   :  { %2206 = vmatprep.subr.bf16.mxu0 %v2855_v29  ;;  %2238 = vmatprep.subr.bf16.mxu1 %v2871_v34 }
 0x230   :  { %1000 = vmatprep.mubr.f32.mxu0 %v2744_v3  ;;  %1071 = vmatprep.mubr.f32.mxu1 %v2744_v3 }
 0x232   :  { %2208 = vmatpush1.bf16.msra.mxu0 %v2873_v35  ;;  %2240 = vmatpush1.bf16.msra.mxu1 %v2883_v38 }
 0x233   :  { %2210 = vmatprep.subr.bf16.mxu0 %v2896_v42  ;;  %2242 = vmatprep.subr.bf16.mxu1 %v2912_v47 }
 0x236   :  { %2212 = vmatpush1.bf16.msra.mxu0 %v2922_v50  ;;  %2244 = vmatpush1.bf16.msra.mxu1 %v2935_v54 }
 0x237   :  { %2214 = vmatprep.subr.bf16.mxu0 %v2948_v58  ;;  %2246 = vmatprep.subr.bf16.mxu1 %v2958_v61 }
 0x23a   :  { %2216 = vmatpush1.bf16.msra.mxu0 %v2971_v1  ;;  %2248 = vmatpush1.bf16.msra.mxu1 %v2981_v5 }
 0x23b   :  { %2218 = vmatprep.subr.bf16.mxu0 %v2991_v8  ;;  %2250 = vmatprep.subr.bf16.mxu1 %v3001_v11 }
 0x23e   :  { %2220 = vmatpush1.bf16.msra.mxu0 %v3014_v15  ;;  %2252 = vmatpush1.bf16.msra.mxu1 %v3024_v19 }
 0x23f   :  { %2222 = vmatprep.subr.bf16.mxu0 %v3034_v24  ;;  %2254 = vmatprep.subr.bf16.mxu1 %v3044_v28 }
 0x242   :  { %2224 = vmatpush1.bf16.msra.mxu0 %v3057_v33  ;;  %2256 = vmatpush1.bf16.msra.mxu1 %v3067_v39 }
 0x243   :  { %2226 = vmatprep.subr.bf16.mxu0 %v3077_v43  ;;  %2258 = vmatprep.subr.bf16.mxu1 %v3087_v46 }
 0x246   :  { %2228 = vmatpush1.bf16.msra.mxu0 %v3100_v52  ;;  %2260 = vmatpush1.bf16.msra.mxu1 %v3110_v56 }
 0x247   :  { %2230 = vmatprep.subr.bf16.mxu0 %v3120_v60  ;;  %2262 = vmatprep.subr.bf16.mxu1 %v3130_v0 }
 0x24a   :  { %2232 = vmatpush1.bf16.msra.mxu0 %v3137_v4  ;;  %2264 = vmatpush1.bf16.msra.mxu1 %v3141_v6 }
 0x24b   :  { %2266 = vmatprep.subr.bf16.mxu0 %v2820_v17  ;;  %2298 = vmatprep.subr.bf16.mxu1 %v2831_v21 }
 0x300   :  { %v828_v10 = vpop.f32.mrb[4].mxu0  ;;  %v899_v20 = vpop.f32.mrb[4].mxu1 }
 0x301   :  { %v2549_v23 = vadd.f32 %v828_v10, %v3193_v14  ;;  %v830_v26 = vpop.f32.mrb[5].mxu0  ;;  %v901_v27 = vpop.f32.mrb[5].mxu1  ;;  %v2565_v41 = vadd.f32 %v899_v20, %v3202_v44 }
 0x302   :  { %v2550_v30 = vadd.f32 %v830_v26, %v3195_v16  ;;  %v2566_v36 = vadd.f32 %v901_v27, %v3199_v37 }
 0x303   :  { %v1929_v31 = vmul.f32 -1.442695, %v2549_v23 }
 0x304   :  { %v1930_v32 = vmul.f32 -1.442695, %v2550_v30  ;;  %v1931_v40 = vmul.f32 -1.442695, %v2566_v36 }
 0x305   :  { %2644 = vpow2.f32 %v1929_v31 }
 0x306   :  { %2646 = vpow2.f32 %v1930_v32 }
 0x307   :  { %2648 = vpow2.f32 %v1931_v40 }
 0x308   :  { %2650 = vtanh.f32 %v2565_v41 }
 0x30f   :  { %v2645_v45 = vpop.eup %2644 }
 0x310   :  { %v2647_v48 = vpop.eup %2646  ;;  %v911_v49 = vadd.f32 1.0, %v2645_v45 }
 0x311   :  { %v917_v51 = vadd.f32 1.0, %v2647_v48  ;;  %v2649_v53 = vpop.eup %2648 }
 0x312   :  { %2652 = vrcp.f32 %v911_v49  ;;  %v2651_v55 = vpop.eup %2650  ;;  %v924_v63 = vadd.f32 1.0, %v2649_v53 }
 0x313   :  { %2654 = vrcp.f32 %v917_v51 }
 0x314   :  { %2656 = vrcp.f32 %v924_v63 }
 0x31c   :  { %v2653_v57 = vpop.eup %2652 }
 0x31d   :  { %v2655_v59 = vpop.eup %2654  ;;  %v928_v62 = vmul.f32 %v2653_v57, %v2651_v55 }
 0x31e   :  { %v927_v2 = vmul.f32 %v2655_v59, %v3247_v9  ;;  %v2657_v12 = vpop.eup %2656 }
 0x320   :  { %v3289_v7 = vadd.f32 %v928_v62, %v927_v2 }
 0x322   :  { %2658 = vtanh.f32 %v3289_v7 }
 0x32c   :  { %v2659_v13 = vpop.eup %2658 }
 0x32d   :  { %v931_v18 = vmul.f32 %v2659_v13, %v2657_v12 }
 0x32f   :  { %1001 = vmatmul.mubr.f32.vlgmr.msra.gmra.mrb[6].mxu0 %v931_v18  ;;  %1072 = vmatmul.mubr.f32.vlgmr.msra.gmra.mrb[6].mxu1 %v931_v18 }
 0x330   :  { %2268 = vmatpush1.bf16.msra.mxu0 %v2833_v22  ;;  %2300 = vmatpush1.bf16.msra.mxu1 %v2842_v25 }
 0x331   :  { %2270 = vmatprep.subr.bf16.mxu0 %v2855_v29  ;;  %2302 = vmatprep.subr.bf16.mxu1 %v2871_v34 }
 0x332   :  { %1174 = vmatprep.mubr.f32.mxu0 %v2744_v3  ;;  %1245 = vmatprep.mubr.f32.mxu1 %v2744_v3 }
 0x334   :  { %2272 = vmatpush1.bf16.msra.mxu0 %v2873_v35  ;;  %2304 = vmatpush1.bf16.msra.mxu1 %v2883_v38 }
 0x335   :  { %2274 = vmatprep.subr.bf16.mxu0 %v2896_v42  ;;  %2306 = vmatprep.subr.bf16.mxu1 %v2912_v47 }
 0x338   :  { %2276 = vmatpush1.bf16.msra.mxu0 %v2922_v50  ;;  %2308 = vmatpush1.bf16.msra.mxu1 %v2935_v54 }
 0x339   :  { %2278 = vmatprep.subr.bf16.mxu0 %v2948_v58  ;;  %2310 = vmatprep.subr.bf16.mxu1 %v2958_v61 }
 0x33c   :  { %2280 = vmatpush1.bf16.msra.mxu0 %v2971_v1  ;;  %2312 = vmatpush1.bf16.msra.mxu1 %v2981_v5 }
 0x33d   :  { %2282 = vmatprep.subr.bf16.mxu0 %v2991_v8  ;;  %2314 = vmatprep.subr.bf16.mxu1 %v3001_v11 }
 0x340   :  { %2284 = vmatpush1.bf16.msra.mxu0 %v3014_v15  ;;  %2316 = vmatpush1.bf16.msra.mxu1 %v3024_v19 }
 0x341   :  { %2286 = vmatprep.subr.bf16.mxu0 %v3034_v24  ;;  %2318 = vmatprep.subr.bf16.mxu1 %v3044_v28 }
 0x344   :  { %2288 = vmatpush1.bf16.msra.mxu0 %v3057_v33  ;;  %2320 = vmatpush1.bf16.msra.mxu1 %v3067_v39 }
 0x345   :  { %2290 = vmatprep.subr.bf16.mxu0 %v3077_v43  ;;  %2322 = vmatprep.subr.bf16.mxu1 %v3087_v46 }
 0x348   :  { %2292 = vmatpush1.bf16.msra.mxu0 %v3100_v52  ;;  %2324 = vmatpush1.bf16.msra.mxu1 %v3110_v56 }
 0x349   :  { %2294 = vmatprep.subr.bf16.mxu0 %v3120_v60  ;;  %2326 = vmatprep.subr.bf16.mxu1 %v3130_v0 }
 0x34c   :  { %2296 = vmatpush1.bf16.msra.mxu0 %v3137_v4  ;;  %2328 = vmatpush1.bf16.msra.mxu1 %v3141_v6 }
 0x34d   :  { %2330 = vmatprep.subr.bf16.mxu0 %v2820_v17  ;;  %2362 = vmatprep.subr.bf16.mxu1 %v2831_v21 }
 0x402   :  { %v1002_v9 = vpop.f32.mrb[6].mxu0  ;;  %v1073_v10 = vpop.f32.mrb[6].mxu1 }
 0x403   :  { %v2551_v20 = vadd.f32 %v1002_v9, %v3193_v14  ;;  %v1004_v23 = vpop.f32.mrb[7].mxu0  ;;  %v1075_v26 = vpop.f32.mrb[7].mxu1  ;;  %v2567_v40 = vadd.f32 %v1073_v10, %v3202_v44 }
 0x404   :  { %v2552_v27 = vadd.f32 %v1004_v23, %v3195_v16  ;;  %v2568_v32 = vadd.f32 %v1075_v26, %v3199_v37 }
 0x405   :  { %v1932_v30 = vmul.f32 -1.442695, %v2551_v20 }
 0x406   :  { %v1933_v31 = vmul.f32 -1.442695, %v2552_v27  ;;  %v1934_v36 = vmul.f32 -1.442695, %v2568_v32 }
 0x407   :  { %2660 = vpow2.f32 %v1932_v30 }
 0x408   :  { %2662 = vpow2.f32 %v1933_v31 }
 0x409   :  { %2664 = vpow2.f32 %v1934_v36 }
 0x40a   :  { %2666 = vtanh.f32 %v2567_v40 }
 0x411   :  { %v2661_v41 = vpop.eup %2660 }
 0x412   :  { %v2663_v45 = vpop.eup %2662  ;;  %v1085_v48 = vadd.f32 1.0, %v2661_v41 }
 0x413   :  { %v1091_v49 = vadd.f32 1.0, %v2663_v45  ;;  %v2665_v51 = vpop.eup %2664 }
 0x414   :  { %2668 = vrcp.f32 %v1085_v48  ;;  %v2667_v53 = vpop.eup %2666  ;;  %v1098_v62 = vadd.f32 1.0, %v2665_v51 }
 0x415   :  { %2670 = vrcp.f32 %v1091_v49 }
 0x416   :  { %2672 = vrcp.f32 %v1098_v62 }
 0x41e   :  { %v2669_v55 = vpop.eup %2668 }
 0x41f   :  { %v2671_v57 = vpop.eup %2670  ;;  %v1102_v59 = vmul.f32 %v2669_v55, %v2667_v53 }
 0x420   :  { %v1101_v63 = vmul.f32 %v2671_v57, %v3289_v7  ;;  %v2673_v12 = vpop.eup %2672 }
 0x422   :  { %v3331_v2 = vadd.f32 %v1102_v59, %v1101_v63 }
 0x424   :  { %2674 = vtanh.f32 %v3331_v2 }
 0x42e   :  { %v2675_v13 = vpop.eup %2674 }
 0x42f   :  { %v1105_v18 = vmul.f32 %v2675_v13, %v2673_v12 }
 0x431   :  { %1175 = vmatmul.mubr.f32.vlgmr.msra.gmra.mrb[8].mxu0 %v1105_v18  ;;  %1246 = vmatmul.mubr.f32.vlgmr.msra.gmra.mrb[8].mxu1 %v1105_v18 }
 0x432   :  { %2332 = vmatpush1.bf16.msra.mxu0 %v2833_v22  ;;  %2364 = vmatpush1.bf16.msra.mxu1 %v2842_v25 }
 0x433   :  { %2334 = vmatprep.subr.bf16.mxu0 %v2855_v29  ;;  %2366 = vmatprep.subr.bf16.mxu1 %v2871_v34 }
 0x434   :  { %1348 = vmatprep.mubr.f32.mxu0 %v2744_v3  ;;  %1419 = vmatprep.mubr.f32.mxu1 %v2744_v3 }
 0x436   :  { %2336 = vmatpush1.bf16.msra.mxu0 %v2873_v35  ;;  %2368 = vmatpush1.bf16.msra.mxu1 %v2883_v38 }
 0x437   :  { %2338 = vmatprep.subr.bf16.mxu0 %v2896_v42  ;;  %2370 = vmatprep.subr.bf16.mxu1 %v2912_v47 }
 0x43a   :  { %2340 = vmatpush1.bf16.msra.mxu0 %v2922_v50  ;;  %2372 = vmatpush1.bf16.msra.mxu1 %v2935_v54 }
 0x43b   :  { %2342 = vmatprep.subr.bf16.mxu0 %v2948_v58  ;;  %2374 = vmatprep.subr.bf16.mxu1 %v2958_v61 }
 0x43e   :  { %2344 = vmatpush1.bf16.msra.mxu0 %v2971_v1  ;;  %2376 = vmatpush1.bf16.msra.mxu1 %v2981_v5 }
 0x43f   :  { %2346 = vmatprep.subr.bf16.mxu0 %v2991_v8  ;;  %2378 = vmatprep.subr.bf16.mxu1 %v3001_v11 }
 0x442   :  { %2348 = vmatpush1.bf16.msra.mxu0 %v3014_v15  ;;  %2380 = vmatpush1.bf16.msra.mxu1 %v3024_v19 }
 0x443   :  { %2350 = vmatprep.subr.bf16.mxu0 %v3034_v24  ;;  %2382 = vmatprep.subr.bf16.mxu1 %v3044_v28 }
 0x446   :  { %2352 = vmatpush1.bf16.msra.mxu0 %v3057_v33  ;;  %2384 = vmatpush1.bf16.msra.mxu1 %v3067_v39 }
 0x447   :  { %2354 = vmatprep.subr.bf16.mxu0 %v3077_v43  ;;  %2386 = vmatprep.subr.bf16.mxu1 %v3087_v46 }
 0x44a   :  { %2356 = vmatpush1.bf16.msra.mxu0 %v3100_v52  ;;  %2388 = vmatpush1.bf16.msra.mxu1 %v3110_v56 }
 0x44b   :  { %2358 = vmatprep.subr.bf16.mxu0 %v3120_v60  ;;  %2390 = vmatprep.subr.bf16.mxu1 %v3130_v0 }
 0x44e   :  { %2360 = vmatpush1.bf16.msra.mxu0 %v3137_v4  ;;  %2392 = vmatpush1.bf16.msra.mxu1 %v3141_v6 }
 0x44f   :  { %2394 = vmatprep.subr.bf16.mxu0 %v2820_v17  ;;  %2426 = vmatprep.subr.bf16.mxu1 %v2831_v21 }
 0x504   :  { %v1176_v7 = vpop.f32.mrb[8].mxu0  ;;  %v1247_v9 = vpop.f32.mrb[8].mxu1 }
 0x505   :  { %v2553_v10 = vadd.f32 %v1176_v7, %v3193_v14  ;;  %v1178_v20 = vpop.f32.mrb[9].mxu0  ;;  %v1249_v23 = vpop.f32.mrb[9].mxu1  ;;  %v2569_v36 = vadd.f32 %v1247_v9, %v3202_v44 }
 0x506   :  { %v2554_v26 = vadd.f32 %v1178_v20, %v3195_v16  ;;  %v2570_v31 = vadd.f32 %v1249_v23, %v3199_v37 }
 0x507   :  { %v1935_v27 = vmul.f32 -1.442695, %v2553_v10 }
 0x508   :  { %v1936_v30 = vmul.f32 -1.442695, %v2554_v26  ;;  %v1937_v32 = vmul.f32 -1.442695, %v2570_v31 }
 0x509   :  { %2676 = vpow2.f32 %v1935_v27 }
 0x50a   :  { %2678 = vpow2.f32 %v1936_v30 }
 0x50b   :  { %2680 = vpow2.f32 %v1937_v32 }
 0x50c   :  { %2682 = vtanh.f32 %v2569_v36 }
 0x513   :  { %v2677_v40 = vpop.eup %2676 }
 0x514   :  { %v2679_v41 = vpop.eup %2678  ;;  %v1259_v45 = vadd.f32 1.0, %v2677_v40 }
 0x515   :  { %v1265_v48 = vadd.f32 1.0, %v2679_v41  ;;  %v2681_v49 = vpop.eup %2680 }
 0x516   :  { %2684 = vrcp.f32 %v1259_v45  ;;  %v2683_v51 = vpop.eup %2682  ;;  %v1272_v59 = vadd.f32 1.0, %v2681_v49 }
 0x517   :  { %2686 = vrcp.f32 %v1265_v48 }
 0x518   :  { %2688 = vrcp.f32 %v1272_v59 }
 0x520   :  { %v2685_v53 = vpop.eup %2684 }
 0x521   :  { %v2687_v55 = vpop.eup %2686  ;;  %v1276_v57 = vmul.f32 %v2685_v53, %v2683_v51 }
 0x522   :  { %v1275_v62 = vmul.f32 %v2687_v55, %v3331_v2  ;;  %v2689_v12 = vpop.eup %2688 }
 0x524   :  { %v3373_v63 = vadd.f32 %v1276_v57, %v1275_v62 }
 0x526   :  { %2690 = vtanh.f32 %v3373_v63 }
 0x530   :  { %v2691_v13 = vpop.eup %2690 }
 0x531   :  { %v1279_v18 = vmul.f32 %v2691_v13, %v2689_v12  ;;  %v1805_v13 = vld [vmem:[%s3522_s4 + $0x18] sm:$0xff] }
 0x533   :  { %1349 = vmatmul.mubr.f32.vlgmr.msra.gmra.mrb[10].mxu0 %v1279_v18  ;;  %1420 = vmatmul.mubr.f32.vlgmr.msra.gmra.mrb[10].mxu1 %v1279_v18 }
 0x534   :  { %2396 = vmatpush1.bf16.msra.mxu0 %v2833_v22  ;;  %2428 = vmatpush1.bf16.msra.mxu1 %v2842_v25 }
 0x535   :  { %2398 = vmatprep.subr.bf16.mxu0 %v2855_v29  ;;  %2430 = vmatprep.subr.bf16.mxu1 %v2871_v34 }
 0x536   :  { %1522 = vmatprep.mubr.f32.mxu0 %v2744_v3  ;;  %1593 = vmatprep.mubr.f32.mxu1 %v2744_v3 }
 0x538   :  { %2400 = vmatpush1.bf16.msra.mxu0 %v2873_v35  ;;  %2432 = vmatpush1.bf16.msra.mxu1 %v2883_v38 }
 0x539   :  { %2402 = vmatprep.subr.bf16.mxu0 %v2896_v42  ;;  %2434 = vmatprep.subr.bf16.mxu1 %v2912_v47 }
 0x53c   :  { %2404 = vmatpush1.bf16.msra.mxu0 %v2922_v50  ;;  %2436 = vmatpush1.bf16.msra.mxu1 %v2935_v54 }
 0x53d   :  { %2406 = vmatprep.subr.bf16.mxu0 %v2948_v58  ;;  %2438 = vmatprep.subr.bf16.mxu1 %v2958_v61 }
 0x540   :  { %2408 = vmatpush1.bf16.msra.mxu0 %v2971_v1  ;;  %2440 = vmatpush1.bf16.msra.mxu1 %v2981_v5 }
 0x541   :  { %2410 = vmatprep.subr.bf16.mxu0 %v2991_v8  ;;  %2442 = vmatprep.subr.bf16.mxu1 %v3001_v11 }
 0x544   :  { %2412 = vmatpush1.bf16.msra.mxu0 %v3014_v15  ;;  %2444 = vmatpush1.bf16.msra.mxu1 %v3024_v19 }
 0x545   :  { %2414 = vmatprep.subr.bf16.mxu0 %v3034_v24  ;;  %2446 = vmatprep.subr.bf16.mxu1 %v3044_v28 }
 0x548   :  { %2416 = vmatpush1.bf16.msra.mxu0 %v3057_v33  ;;  %2448 = vmatpush1.bf16.msra.mxu1 %v3067_v39 }
 0x549   :  { %2418 = vmatprep.subr.bf16.mxu0 %v3077_v43  ;;  %2450 = vmatprep.subr.bf16.mxu1 %v3087_v46 }
 0x54c   :  { %2420 = vmatpush1.bf16.msra.mxu0 %v3100_v52  ;;  %2452 = vmatpush1.bf16.msra.mxu1 %v3110_v56 }
 0x54d   :  { %2422 = vmatprep.subr.bf16.mxu0 %v3120_v60  ;;  %2454 = vmatprep.subr.bf16.mxu1 %v3130_v0 }
 0x550   :  { %2424 = vmatpush1.bf16.msra.mxu0 %v3137_v4  ;;  %2456 = vmatpush1.bf16.msra.mxu1 %v3141_v6 }
 0x551   :  { %2458 = vmatprep.subr.bf16.mxu0 %v2820_v17  ;;  %2490 = vmatprep.subr.bf16.mxu1 %v2831_v21 }
 0x606   :  { %v1350_v2 = vpop.f32.mrb[10].mxu0  ;;  %v1421_v7 = vpop.f32.mrb[10].mxu1 }
 0x607   :  { %v2555_v9 = vadd.f32 %v1350_v2, %v3193_v14  ;;  %v1352_v10 = vpop.f32.mrb[11].mxu0  ;;  %v1423_v20 = vpop.f32.mrb[11].mxu1  ;;  %v2571_v32 = vadd.f32 %v1421_v7, %v3202_v44  ;;  %v1806_v2 = vld [vmem:[%s3522_s4 + $0x20] sm:$0xff]  ;;  %v1807_v7 = vld [vmem:[%s3522_s4 + $0x28] sm:$0xff] }
 0x608   :  { %v2556_v23 = vadd.f32 %v1352_v10, %v3195_v16  ;;  %v2572_v30 = vadd.f32 %v1423_v20, %v3199_v37  ;;  %v1808_v10 = vld [vmem:[%s3522_s4 + $0x30] sm:$0xff]  ;;  %v1809_v20 = vld [vmem:[%s3522_s4 + $0x38] sm:$0xff] }
 0x609   :  { %v1938_v26 = vmul.f32 -1.442695, %v2555_v9  ;;  %v2528_v9 = vpack.c.bf16 %v1807_v7, %v1806_v2 }
 0x60a   :  { %v1939_v27 = vmul.f32 -1.442695, %v2556_v23  ;;  %v1940_v31 = vmul.f32 -1.442695, %v2572_v30  ;;  %v2531_v23 = vpack.c.bf16 %v1809_v20, %v1808_v10 }
 0x60b   :  { %2692 = vpow2.f32 %v1938_v26  ;;  %v1810_v26 = vld [vmem:[%s3522_s4 + $0x40] sm:$0xff] }
 0x60c   :  { %2694 = vpow2.f32 %v1939_v27  ;;  %v1811_v27 = vld [vmem:[%s3522_s4 + $0x48] sm:$0xff] }
 0x60d   :  { %2696 = vpow2.f32 %v1940_v31  ;;  %v2534_v30 = vpack.c.bf16 %v1811_v27, %v1810_v26  ;;  %v1812_v31 = vld [vmem:[%s3522_s4 + $0x50] sm:$0xff] }
 0x60e   :  { %2698 = vtanh.f32 %v2571_v32  ;;  %v1813_v32 = vld [vmem:[%s3522_s4 + $0x58] sm:$0xff] }
 0x615   :  { %v2693_v17 = vpop.eup %2692 }
 0x616   :  { %v2695_v36 = vpop.eup %2694  ;;  %v1433_v21 = vadd.f32 1.0, %v2693_v17  ;;  %v1814_v17 = vld [vmem:[%s3522_s4 + $0x60] sm:$0xff] }
 0x617   :  { %v1439_v40 = vadd.f32 1.0, %v2695_v36  ;;  %v2697_v41 = vpop.eup %2696  ;;  %v2537_v36 = vpack.c.bf16 %v1813_v32, %v1812_v31 }
 0x618   :  { %2700 = vrcp.f32 %v1433_v21  ;;  %v2699_v45 = vpop.eup %2698  ;;  %v1446_v53 = vadd.f32 1.0, %v2697_v41  ;;  %v1815_v21 = vld [vmem:[%s3522_s4 + $0x68] sm:$0xff]  ;;  %v1816_v41 = vld [vmem:[%s3522_s4 + $0x70] sm:$0xff] }
 0x619   :  { %2702 = vrcp.f32 %v1439_v40  ;;  %v2540_v40 = vpack.c.bf16 %v1815_v21, %v1814_v17 }
 0x61a   :  { %2704 = vrcp.f32 %v1446_v53 }
 0x622   :  { %v2701_v48 = vpop.eup %2700 }
 0x623   :  { %v2703_v49 = vpop.eup %2702  ;;  %v1450_v51 = vmul.f32 %v2701_v48, %v2699_v45  ;;  %v1817_v45 = vld [vmem:[%s3522_s4 + $0x78] sm:$0xff] }
 0x624   :  { %v1449_v55 = vmul.f32 %v2703_v49, %v3373_v63  ;;  %v2705_v59 = vpop.eup %2704  ;;  %v1804_v63 = vld [vmem:[%s3522_s4 + $0x10] sm:$0xff]  ;;  %v2543_v48 = vpack.c.bf16 %v1817_v45, %v1816_v41  ;;  %v11_v49 = vstv %s3523_s5 }
 0x625   :  { %v2525_v18 = vpack.c.bf16 %v1805_v13, %v1804_v63  ;;  %12 = vst [vmem:[#allocation3] sm:$0x1] %v11_v49 }
 0x626   :  { %v3415_v57 = vadd.f32 %v1450_v51, %v1449_v55 }
 0x628   :  { %2706 = vtanh.f32 %v3415_v57 }
 0x632   :  { %v2707_v62 = vpop.eup %2706 }
 0x633   :  { %v1453_v12 = vmul.f32 %v2707_v62, %v2705_v59 }
 0x635   :  { %1523 = vmatmul.mubr.f32.vlgmr.msra.gmra.mrb[12].mxu0 %v1453_v12  ;;  %1594 = vmatmul.mubr.f32.vlgmr.msra.gmra.mrb[12].mxu1 %v1453_v12 }
 0x636   :  { %2460 = vmatpush1.bf16.msra.mxu0 %v2833_v22  ;;  %2492 = vmatpush1.bf16.msra.mxu1 %v2842_v25 }
 0x637   :  { %2462 = vmatprep.subr.bf16.mxu0 %v2855_v29  ;;  %2494 = vmatprep.subr.bf16.mxu1 %v2871_v34 }
 0x638   :  { %1696 = vmatprep.mubr.f32.mxu0 %v2744_v3  ;;  %1767 = vmatprep.mubr.f32.mxu1 %v2744_v3 }
 0x63a   :  { %2464 = vmatpush1.bf16.msra.mxu0 %v2873_v35  ;;  %2496 = vmatpush1.bf16.msra.mxu1 %v2883_v38 }
 0x63b   :  { %2466 = vmatprep.subr.bf16.mxu0 %v2896_v42  ;;  %2498 = vmatprep.subr.bf16.mxu1 %v2912_v47 }
 0x63e   :  { %2468 = vmatpush1.bf16.msra.mxu0 %v2922_v50  ;;  %2500 = vmatpush1.bf16.msra.mxu1 %v2935_v54 }
 0x63f   :  { %2470 = vmatprep.subr.bf16.mxu0 %v2948_v58  ;;  %2502 = vmatprep.subr.bf16.mxu1 %v2958_v61 }
 0x642   :  { %2472 = vmatpush1.bf16.msra.mxu0 %v2971_v1  ;;  %2504 = vmatpush1.bf16.msra.mxu1 %v2981_v5 }
 0x643   :  { %2474 = vmatprep.subr.bf16.mxu0 %v2991_v8  ;;  %2506 = vmatprep.subr.bf16.mxu1 %v3001_v11 }
 0x646   :  { %2476 = vmatpush1.bf16.msra.mxu0 %v3014_v15  ;;  %2508 = vmatpush1.bf16.msra.mxu1 %v3024_v19 }
 0x647   :  { %2478 = vmatprep.subr.bf16.mxu0 %v3034_v24  ;;  %2510 = vmatprep.subr.bf16.mxu1 %v3044_v28 }
 0x64a   :  { %2480 = vmatpush1.bf16.msra.mxu0 %v3057_v33  ;;  %2512 = vmatpush1.bf16.msra.mxu1 %v3067_v39 }
 0x64b   :  { %2482 = vmatprep.subr.bf16.mxu0 %v3077_v43  ;;  %2514 = vmatprep.subr.bf16.mxu1 %v3087_v46 }
 0x64e   :  { %2484 = vmatpush1.bf16.msra.mxu0 %v3100_v52  ;;  %2516 = vmatpush1.bf16.msra.mxu1 %v3110_v56 }
 0x64f   :  { %2486 = vmatprep.subr.bf16.mxu0 %v3120_v60  ;;  %2518 = vmatprep.subr.bf16.mxu1 %v3130_v0  ;;  %v1802_v60 = vld [vmem:[%s3522_s4] sm:$0xff]  ;;  %v1803_v0 = vld [vmem:[%s3522_s4 + $0x8] sm:$0xff] }
 0x652   :  { %2488 = vmatpush1.bf16.msra.mxu0 %v3137_v4  ;;  %2520 = vmatpush1.bf16.msra.mxu1 %v3141_v6  ;;  %v2522_v4 = vpack.c.bf16 %v1803_v0, %v1802_v60  ;;  %v2745_v6 = vmov 0.0|0.0  }
 0x653   :  { %2521 = vmatprep.subr.bf16.mxu0 %v2745_v6 }
 0x708   :  { %v1524_v22 = vpop.f32.mrb[12].mxu0  ;;  %v1595_v25 = vpop.f32.mrb[12].mxu1 }
 0x709   :  { %v2557_v29 = vadd.f32 %v1524_v22, %v3193_v14  ;;  %v1526_v34 = vpop.f32.mrb[13].mxu0  ;;  %v1597_v35 = vpop.f32.mrb[13].mxu1  ;;  %v2573_v58 = vadd.f32 %v1595_v25, %v3202_v44 }
 0x70a   :  { %v2558_v38 = vadd.f32 %v1526_v34, %v3195_v16  ;;  %v2574_v50 = vadd.f32 %v1597_v35, %v3199_v37 }
 0x70b   :  { %v1941_v42 = vmul.f32 -1.442695, %v2557_v29 }
 0x70c   :  { %v1942_v47 = vmul.f32 -1.442695, %v2558_v38  ;;  %v1943_v54 = vmul.f32 -1.442695, %v2574_v50 }
 0x70d   :  { %2708 = vpow2.f32 %v1941_v42 }
 0x70e   :  { %2710 = vpow2.f32 %v1942_v47 }
 0x70f   :  { %2712 = vpow2.f32 %v1943_v54 }
 0x710   :  { %2714 = vtanh.f32 %v2573_v58 }
 0x717   :  { %v2709_v61 = vpop.eup %2708 }
 0x718   :  { %v2711_v1 = vpop.eup %2710  ;;  %v1607_v5 = vadd.f32 1.0, %v2709_v61 }
 0x719   :  { %v1613_v8 = vadd.f32 1.0, %v2711_v1  ;;  %v2713_v11 = vpop.eup %2712 }
 0x71a   :  { %2716 = vrcp.f32 %v1607_v5  ;;  %v2715_v15 = vpop.eup %2714  ;;  %v1620_v33 = vadd.f32 1.0, %v2713_v11 }
 0x71b   :  { %2718 = vrcp.f32 %v1613_v8  ;;  %v1947_v8 = vld [vmem:[#allocation3] ss:$0 sm:$0xff] }
 0x71c   :  { %2720 = vrcp.f32 %v1620_v33 }
 0x724   :  { %v2717_v19 = vpop.eup %2716 }
 0x725   :  { %v2719_v24 = vpop.eup %2718  ;;  %v1624_v28 = vmul.f32 %v2717_v19, %v2715_v15 }
 0x726   :  { %v1623_v39 = vmul.f32 %v2719_v24, %v3415_v57  ;;  %v2721_v46 = vpop.eup %2720 }
 0x728   :  { %v3455_v43 = vadd.f32 %v1624_v28, %v1623_v39 }
 0x72a   :  { %2722 = vtanh.f32 %v3455_v43 }
 0x734   :  { %v2723_v52 = vpop.eup %2722 }
 0x735   :  { %v1627_v56 = vmul.f32 %v2723_v52, %v2721_v46 }
 0x737   :  { %1697 = vmatmul.mubr.f32.vlgmr.msra.gmra.mrb[14].mxu0 %v1627_v56  ;;  %1768 = vmatmul.mubr.f32.vlgmr.msra.gmra.mrb[14].mxu1 %v1627_v56 }
 0x738   :  { %2523 = vmatpush3.bf16.msra.mxu0 %v2522_v4  ;;  %1998 = vmatprep.mubr.msk.f32.mxu0 %vm2746_vm1, %v2744_v3 }
 0x739   :  { %2524 = vmatprep.subr.bf16.mxu0 %v2745_v6 }
 0x73c   :  { %2526 = vmatpush3.bf16.msra.mxu0 %v2525_v18 }
 0x73d   :  { %2527 = vmatprep.subr.bf16.mxu0 %v2745_v6 }
 0x740   :  { %2529 = vmatpush3.bf16.msra.mxu0 %v2528_v9 }
 0x741   :  { %2530 = vmatprep.subr.bf16.mxu0 %v2745_v6 }
 0x744   :  { %2532 = vmatpush3.bf16.msra.mxu0 %v2531_v23 }
 0x745   :  { %2533 = vmatprep.subr.bf16.mxu0 %v2745_v6 }
 0x748   :  { %2535 = vmatpush3.bf16.msra.mxu0 %v2534_v30 }
 0x749   :  { %2536 = vmatprep.subr.bf16.mxu0 %v2745_v6 }
 0x74c   :  { %2538 = vmatpush3.bf16.msra.mxu0 %v2537_v36 }
 0x74d   :  { %2539 = vmatprep.subr.bf16.mxu0 %v2745_v6 }
 0x750   :  { %2541 = vmatpush3.bf16.msra.mxu0 %v2540_v40 }
 0x751   :  { %2542 = vmatprep.subr.bf16.mxu0 %v2745_v6 }
 0x754   :  { %2544 = vmatpush3.bf16.msra.mxu0 %v2543_v48 }
 0x80a   :  { %v1698_v3 = vpop.f32.mrb[14].mxu0  ;;  %v1769_v51 = vpop.f32.mrb[14].mxu1 }
 0x80b   :  { %v2559_v53 = vadd.f32 %v1698_v3, %v3193_v14  ;;  %v1700_v55 = vpop.f32.mrb[15].mxu0  ;;  %v1771_v57 = vpop.f32.mrb[15].mxu1  ;;  %v2575_v29 = vadd.f32 %v1769_v51, %v3202_v44 }
 0x80c   :  { %v2560_v59 = vadd.f32 %v1700_v55, %v3195_v16  ;;  %v2576_v22 = vadd.f32 %v1771_v57, %v3199_v37 }
 0x80d   :  { %v1944_v62 = vmul.f32 -1.442695, %v2559_v53 }
 0x80e   :  { %v1945_v12 = vmul.f32 -1.442695, %v2560_v59  ;;  %v1946_v25 = vmul.f32 -1.442695, %v2576_v22 }
 0x80f   :  { %2724 = vpow2.f32 %v1944_v62 }
 0x810   :  { %2726 = vpow2.f32 %v1945_v12 }
 0x811   :  { %2728 = vpow2.f32 %v1946_v25 }
 0x812   :  { %2730 = vtanh.f32 %v2575_v29 }
 0x819   :  { %v2725_v34 = vpop.eup %2724 }
 0x81a   :  { %v2727_v35 = vpop.eup %2726  ;;  %v1781_v38 = vadd.f32 1.0, %v2725_v34 }
 0x81b   :  { %v1787_v42 = vadd.f32 1.0, %v2727_v35  ;;  %v2729_v14 = vpop.eup %2728 }
 0x81c   :  { %2732 = vrcp.f32 %v1781_v38  ;;  %v2731_v47 = vpop.eup %2730  ;;  %v1794_v58 = vadd.f32 1.0, %v2729_v14 }
 0x81d   :  { %2734 = vrcp.f32 %v1787_v42 }
 0x81e   :  { %2736 = vrcp.f32 %v1794_v58 }
 0x826   :  { %v2733_v16 = vpop.eup %2732 }
 0x827   :  { %v2735_v50 = vpop.eup %2734  ;;  %v1798_v54 = vmul.f32 %v2733_v16, %v2731_v47 }
 0x828   :  { %v1797_v61 = vmul.f32 %v2735_v50, %v3455_v43  ;;  %v2737_v44 = vpop.eup %2736 }
 0x82a   :  { %v1799_v37 = vadd.f32 %v1798_v54, %v1797_v61 }
 0x82c   :  { %2738 = vtanh.f32 %v1799_v37 }
 0x836   :  { %v2739_v1 = vpop.eup %2738 }
 0x837   :  { %v1801_v5 = vmul.f32 %v2739_v1, %v2737_v44 }
 0x839   :  { %1999 = vmatmul.mubr.f32.vlgmr.msra.gmra.mrb[16].mxu0 %v1801_v5 }
 0x90c   :  { %v1891_v11 = vpop.f32.mrb[16].mxu0 }
 0x90d   :  { %v1892_v15 = vadd.f32 %v1947_v8, %v1891_v11  ;;  %v2000_v19 = vpop.f32.mrb[17].mxu0 }
 0x90f   :  { %v1948_v24 = vmul.f32 -1.442695, %v1892_v15 }
 0x911   :  { %2740 = vpow2.f32 %v1948_v24 }
 0x91b   :  { %v2741_v28 = vpop.eup %2740 }
 0x91c   :  { %v1898_v33 = vadd.f32 1.0, %v2741_v28 }
 0x91e   :  { %2742 = vrcp.f32 %v1898_v33 }
 0x928   :  { %v2743_v39 = vpop.eup %2742 }
 0x929   :  { %1902 = vst.msk [vmem:[%s3524_s6] sm:$0xff] %vm1901_vm2, %v2743_v39 }

</bundles_post_ra>
